<compile_context>
chip_gen: v7x
topology: tpu7x:2x2x1
jax: 0.10.0
libtpu: 0.0.40
codegen_flags: <defaults>
</compile_context>

<pallas_src>
import functools

import jax
import jax.numpy as jnp
from jax.experimental import pallas as pl
from jax.experimental.pallas import tpu as pltpu

N_EMBD = 384          # n_embd from the module
BLOCK_SIZE = 128      # block_size from the module (max T for the causal mask)


# ---------------------------------------------------------------------------
# Fused kernel: QKV projection + per-head causal attention + concat + out-proj.
# grid = (B,). Each program handles one full (T, C) batch row.
# ---------------------------------------------------------------------------
def _mha_fused_kernel(x_ref, wqkv_ref, wproj_ref, b_ref, o_ref,
                      *, num_heads, head_size):
    H, hs = num_heads, head_size

    x = x_ref[0].astype(jnp.bfloat16)                     # (T, C)
    T = x.shape[0]

    # Stacked QKV projection: (T, C) @ (C, 3*H*hs) -> (T, 3*H*hs), f32 acc.
    # The attention scale (C**-0.5) is already folded into the Q columns.
    qkv = jnp.dot(x, wqkv_ref[...], preferred_element_type=jnp.float32)
    qkv_b = qkv.astype(jnp.bfloat16)

    # Causal mask (T <= BLOCK_SIZE; tril semantics of the PyTorch module).
    # Built once per grid step, reused by every head.
    row = jax.lax.broadcasted_iota(jnp.int32, (T, T), 0)
    col = jax.lax.broadcasted_iota(jnp.int32, (T, T), 1)
    causal = col <= row
    neg = jnp.float32(-1e30)

    head_outs = []
    for h in range(H):                                    # H=6, static unroll
        q = qkv_b[:, h * hs:(h + 1) * hs]                 # (T, hs) bf16 (scaled)
        k = qkv_b[:, (H + h) * hs:(H + h + 1) * hs]       # (T, hs) bf16
        v = qkv_b[:, (2 * H + h) * hs:(2 * H + h + 1) * hs]

        # scores = q @ k^T  (contraction on last dims; no transpose copy)
        s = jax.lax.dot_general(q, k, (((1,), (1,)), ((), ())),
                                preferred_element_type=jnp.float32)  # (T, T)
        s = jnp.where(causal, s, neg)

        # numerically-stable softmax, normalization deferred past PV matmul
        m = jnp.max(s, axis=-1, keepdims=True)
        e = jnp.exp(s - m)                                # (T, T) f32
        l = jnp.sum(e, axis=-1, keepdims=True)            # (T, 1)

        acc = jnp.dot(e.astype(jnp.bfloat16), v,
                      preferred_element_type=jnp.float32)  # (T, hs) f32
        head_outs.append(acc * pl.reciprocal(l, approx=True))

    # concat over heads -> (T, C), then output projection + bias (lane-dense).
    cat = jnp.concatenate(head_outs, axis=-1).astype(jnp.bfloat16)   # (T, C)
    y = jnp.dot(cat, wproj_ref[...], preferred_element_type=jnp.float32)
    o_ref[0] = (y + b_ref[...]).astype(o_ref.dtype)       # (T, C) + (1, C)


def multi_head_attention(x, packed, *, num_heads, head_size):
    """x: (B, T, C) f32; packed weights from pack_params(). Returns (B, T, C)."""
    B, T, C = x.shape
    H, hs = num_heads, head_size
    assert H * hs == C
    assert T <= BLOCK_SIZE

    kernel = functools.partial(_mha_fused_kernel,
                               num_heads=H, head_size=hs)

    return pl.pallas_call(
        kernel,
        out_shape=jax.ShapeDtypeStruct((B, T, C), jnp.float32),
        grid_spec=pltpu.PrefetchScalarGridSpec(
            num_scalar_prefetch=0,
            grid=(B,),
            in_specs=[
                pl.BlockSpec((1, T, C), lambda b: (b, 0, 0)),          # x
                pl.BlockSpec((C, 3 * H * hs), lambda b: (0, 0)),       # wqkv
                pl.BlockSpec((C, C), lambda b: (0, 0)),                # w_proj
                pl.BlockSpec((1, C), lambda b: (0, 0)),                # b_proj
            ],
            out_specs=pl.BlockSpec((1, T, C), lambda b: (b, 0, 0)),
        ),
        compiler_params=pltpu.CompilerParams(
            dimension_semantics=("parallel",)),
    )(x, packed["wqkv"], packed["w_proj"], packed["b_proj"])


# ---------------------------------------------------------------------------
# Parameter handling
# ---------------------------------------------------------------------------
def init_params(key, num_heads, head_size):
    k1, k2, k3, k4, k5 = jax.random.split(key, 5)
    s_in = 1.0 / (N_EMBD ** 0.5)
    wq = jax.random.uniform(k1, (num_heads, N_EMBD, head_size),
                            jnp.float32, -s_in, s_in)
    wk = jax.random.uniform(k2, (num_heads, N_EMBD, head_size),
                            jnp.float32, -s_in, s_in)
    wv = jax.random.uniform(k3, (num_heads, N_EMBD, head_size),
                            jnp.float32, -s_in, s_in)
    # nn.Linear(n_embd, n_embd): weight (out,in) -> stored transposed (in,out)
    w_proj = jax.random.uniform(k4, (N_EMBD, N_EMBD), jnp.float32, -s_in, s_in)
    b_proj = jax.random.uniform(k5, (1, N_EMBD), jnp.float32, -s_in, s_in)
    return dict(wq=wq, wk=wk, wv=wv, w_proj=w_proj, b_proj=b_proj)


def pack_params(params):
    """One-time weight transform: stack QKV per-head weights into (C, 3*H*hs),
    fold the C**-0.5 attention scale into the Q block, cast matmul weights to
    bf16 (MXU-native), keep the bias in f32."""
    wq, wk, wv = params["wq"], params["wk"], params["wv"]   # (H, C, hs)
    H, C, hs = wq.shape
    scale = jnp.float32(C) ** jnp.float32(-0.5)             # module uses C**-0.5

    def stack(w):                                           # (H,C,hs)->(C,H*hs)
        return jnp.transpose(w, (1, 0, 2)).reshape(C, H * hs)

    wqkv = jnp.concatenate([stack(wq * scale), stack(wk), stack(wv)], axis=1)
    return dict(
        wqkv=jnp.asarray(wqkv, jnp.bfloat16),               # (C, 3*H*hs)
        w_proj=jnp.asarray(params["w_proj"], jnp.bfloat16), # (C, C)
        b_proj=jnp.asarray(params["b_proj"], jnp.float32),  # (1, C)
    )


# ---------------------------------------------------------------------------
# Pure-JAX f32 reference mirroring the PyTorch forward (eval mode)
# ---------------------------------------------------------------------------
def _reference(x, params):
    B, T, C = x.shape
    wq, wk, wv = params["wq"], params["wk"], params["wv"]
    H, _, hs = wq.shape
    outs = []
    tril = jnp.tril(jnp.ones((T, T)))
    for h in range(H):
        q = x @ wq[h]
        k = x @ wk[h]
        v = x @ wv[h]
        w = (q @ jnp.swapaxes(k, -2, -1)) * (C ** -0.5)
        w = jnp.where(tril == 0, -jnp.inf, w)
        w = jax.nn.softmax(w, axis=-1)
        outs.append(w @ v)
    cat = jnp.concatenate(outs, axis=-1)
    return cat @ params["w_proj"] + params["b_proj"][0]


if __name__ == "__main__":
    key = jax.random.PRNGKey(0)
    kx, kp = jax.random.split(key)

    B, T = 2, 16                  # T <= block_size (128)
    num_heads, head_size = 6, 64  # 6 * 64 = 384 = n_embd
    x = jax.random.normal(kx, (B, T, N_EMBD), jnp.float32)
    params = init_params(kp, num_heads, head_size)
    packed = pack_params(params)

    out = multi_head_attention(x, packed,
                               num_heads=num_heads, head_size=head_size)
    out = jax.block_until_ready(out)

    ref = _reference(x, params)
    assert out.shape == (B, T, N_EMBD)

    # bf16 MXU matmuls + approx reciprocal -> compare with a relaxed tolerance.
    max_err = float(jnp.max(jnp.abs(out - ref)))
    ref_scale = float(jnp.max(jnp.abs(ref)))
    assert max_err <= 0.05 * max(ref_scale, 1.0), (
        f"mismatch vs reference: max_err={max_err}, ref_scale={ref_scale}")

    print("KERNEL_OK")
</pallas_src>

<mosaic_0001>
module attributes {stable_mosaic.version = 11 : i64} {
  func.func @_mha_fused_kernel(%arg0: i32, %arg1: memref<1x16x384xf32, #tpu.memory_space<vmem>>, %arg2: memref<384x1152xbf16, #tpu.memory_space<vmem>>, %arg3: memref<384x384xbf16, #tpu.memory_space<vmem>>, %arg4: memref<1x384xf32, #tpu.memory_space<vmem>>, %arg5: memref<1x16x384xf32, #tpu.memory_space<vmem>>) attributes {dimension_semantics = [#tpu.dimension_semantics<parallel>], iteration_bounds = array<i64: 2>, scalar_prefetch = 0 : i64, scratch_operands = 0 : i64, tpu.core_type = #tpu.core_type<tc>, window_params = [{transform_indices = @transform_0, window_bounds = array<i64: 1, 16, 384>}, {pipeline_mode = #tpu.pipeline_mode<synchronous>, transform_indices = @transform_1, window_bounds = array<i64: 384, 1152>}, {pipeline_mode = #tpu.pipeline_mode<synchronous>, transform_indices = @transform_2, window_bounds = array<i64: 384, 384>}, {pipeline_mode = #tpu.pipeline_mode<synchronous>, transform_indices = @transform_3, window_bounds = array<i64: 1, 384>}, {transform_indices = @transform_4, window_bounds = array<i64: 1, 16, 384>}]} {
    %c0 = arith.constant 0 : index
    %c0_0 = arith.constant 0 : index
    %c0_1 = arith.constant 0 : index
    %0 = vector.load %arg1[%c0, %c0_0, %c0_1] : memref<1x16x384xf32, #tpu.memory_space<vmem>>, vector<1x16x384xf32>
    %1 = vector.shape_cast %0 : vector<1x16x384xf32> to vector<16x384xf32>
    %2 = arith.truncf %1 : vector<16x384xf32> to vector<16x384xbf16>
    %c0_2 = arith.constant 0 : index
    %c0_3 = arith.constant 0 : index
    %3 = vector.load %arg2[%c0_2, %c0_3] : memref<384x1152xbf16, #tpu.memory_space<vmem>>, vector<384x1152xbf16>
    %cst = arith.constant dense<0.000000e+00> : vector<16x1152xf32>
    %4 = tpu.matmul %2, %3, %cst {dimension_numbers = #tpu.dot_dimension_numbers<[1], [0], [0], [1], [0, 0, 1, 1], [], []>} : vector<16x384xbf16>, vector<384x1152xbf16>, vector<16x1152xf32> -> vector<16x1152xf32>
    %5 = arith.truncf %4 : vector<16x1152xf32> to vector<16x1152xbf16>
    %6 = tpu.iota {dimensions = array<i32: 0>} : vector<16x16xi32>
    %7 = tpu.iota {dimensions = array<i32: 1>} : vector<16x16xi32>
    %8 = arith.cmpi sle, %7, %6 : vector<16x16xi32>
    %9 = vector.extract_strided_slice %5 {offsets = [0, 0], sizes = [16, 64], strides = [1, 1]} : vector<16x1152xbf16> to vector<16x64xbf16>
    %10 = vector.extract_strided_slice %5 {offsets = [0, 384], sizes = [16, 64], strides = [1, 1]} : vector<16x1152xbf16> to vector<16x64xbf16>
    %11 = vector.extract_strided_slice %5 {offsets = [0, 768], sizes = [16, 64], strides = [1, 1]} : vector<16x1152xbf16> to vector<16x64xbf16>
    %cst_4 = arith.constant dense<0.000000e+00> : vector<16x16xf32>
    %12 = tpu.matmul %9, %10, %cst_4 {dimension_numbers = #tpu.dot_dimension_numbers<[1], [1], [0], [0], [0, 0, 1, 0], [], []>} : vector<16x64xbf16>, vector<16x64xbf16>, vector<16x16xf32> -> vector<16x16xf32>
    %cst_5 = arith.constant -1.000000e+30 : f32
    %13 = vector.broadcast %cst_5 : f32 to vector<16x16xf32>
    %14 = arith.select %8, %12, %13 : vector<16x16xi1>, vector<16x16xf32>
    %cst_6 = arith.constant dense<0xFF800000> : vector<16xf32>
    %15 = vector.multi_reduction <maximumf>, %14, %cst_6 [1] : vector<16x16xf32> to vector<16xf32>
    %16 = vector.shape_cast %15 : vector<16xf32> to vector<16x1xf32>
    %17 = vector.broadcast %16 : vector<16x1xf32> to vector<16x16xf32>
    %18 = arith.subf %14, %17 : vector<16x16xf32>
    %19 = math.exp %18 : vector<16x16xf32>
    %cst_7 = arith.constant dense<0.000000e+00> : vector<16xf32>
    %20 = vector.multi_reduction <add>, %19, %cst_7 [1] : vector<16x16xf32> to vector<16xf32>
    %21 = vector.shape_cast %20 : vector<16xf32> to vector<16x1xf32>
    %22 = arith.truncf %19 : vector<16x16xf32> to vector<16x16xbf16>
    %cst_8 = arith.constant dense<0.000000e+00> : vector<16x64xf32>
    %23 = tpu.matmul %22, %11, %cst_8 {dimension_numbers = #tpu.dot_dimension_numbers<[1], [0], [0], [1], [0, 0, 1, 1], [], []>} : vector<16x16xbf16>, vector<16x64xbf16>, vector<16x64xf32> -> vector<16x64xf32>
    %24 = tpu.reciprocal %21 {approx = true} : vector<16x1xf32> -> vector<16x1xf32>
    %25 = vector.broadcast %24 : vector<16x1xf32> to vector<16x64xf32>
    %26 = arith.mulf %23, %25 : vector<16x64xf32>
    %27 = vector.extract_strided_slice %5 {offsets = [0, 64], sizes = [16, 64], strides = [1, 1]} : vector<16x1152xbf16> to vector<16x64xbf16>
    %28 = vector.extract_strided_slice %5 {offsets = [0, 448], sizes = [16, 64], strides = [1, 1]} : vector<16x1152xbf16> to vector<16x64xbf16>
    %29 = vector.extract_strided_slice %5 {offsets = [0, 832], sizes = [16, 64], strides = [1, 1]} : vector<16x1152xbf16> to vector<16x64xbf16>
    %cst_9 = arith.constant dense<0.000000e+00> : vector<16x16xf32>
    %30 = tpu.matmul %27, %28, %cst_9 {dimension_numbers = #tpu.dot_dimension_numbers<[1], [1], [0], [0], [0, 0, 1, 0], [], []>} : vector<16x64xbf16>, vector<16x64xbf16>, vector<16x16xf32> -> vector<16x16xf32>
    %cst_10 = arith.constant -1.000000e+30 : f32
    %31 = vector.broadcast %cst_10 : f32 to vector<16x16xf32>
    %32 = arith.select %8, %30, %31 : vector<16x16xi1>, vector<16x16xf32>
    %cst_11 = arith.constant dense<0xFF800000> : vector<16xf32>
    %33 = vector.multi_reduction <maximumf>, %32, %cst_11 [1] : vector<16x16xf32> to vector<16xf32>
    %34 = vector.shape_cast %33 : vector<16xf32> to vector<16x1xf32>
    %35 = vector.broadcast %34 : vector<16x1xf32> to vector<16x16xf32>
    %36 = arith.subf %32, %35 : vector<16x16xf32>
    %37 = math.exp %36 : vector<16x16xf32>
    %cst_12 = arith.constant dense<0.000000e+00> : vector<16xf32>
    %38 = vector.multi_reduction <add>, %37, %cst_12 [1] : vector<16x16xf32> to vector<16xf32>
    %39 = vector.shape_cast %38 : vector<16xf32> to vector<16x1xf32>
    %40 = arith.truncf %37 : vector<16x16xf32> to vector<16x16xbf16>
    %cst_13 = arith.constant dense<0.000000e+00> : vector<16x64xf32>
    %41 = tpu.matmul %40, %29, %cst_13 {dimension_numbers = #tpu.dot_dimension_numbers<[1], [0], [0], [1], [0, 0, 1, 1], [], []>} : vector<16x16xbf16>, vector<16x64xbf16>, vector<16x64xf32> -> vector<16x64xf32>
    %42 = tpu.reciprocal %39 {approx = true} : vector<16x1xf32> -> vector<16x1xf32>
    %43 = vector.broadcast %42 : vector<16x1xf32> to vector<16x64xf32>
    %44 = arith.mulf %41, %43 : vector<16x64xf32>
    %45 = vector.extract_strided_slice %5 {offsets = [0, 128], sizes = [16, 64], strides = [1, 1]} : vector<16x1152xbf16> to vector<16x64xbf16>
    %46 = vector.extract_strided_slice %5 {offsets = [0, 512], sizes = [16, 64], strides = [1, 1]} : vector<16x1152xbf16> to vector<16x64xbf16>
    %47 = vector.extract_strided_slice %5 {offsets = [0, 896], sizes = [16, 64], strides = [1, 1]} : vector<16x1152xbf16> to vector<16x64xbf16>
    %cst_14 = arith.constant dense<0.000000e+00> : vector<16x16xf32>
    %48 = tpu.matmul %45, %46, %cst_14 {dimension_numbers = #tpu.dot_dimension_numbers<[1], [1], [0], [0], [0, 0, 1, 0], [], []>} : vector<16x64xbf16>, vector<16x64xbf16>, vector<16x16xf32> -> vector<16x16xf32>
    %cst_15 = arith.constant -1.000000e+30 : f32
    %49 = vector.broadcast %cst_15 : f32 to vector<16x16xf32>
    %50 = arith.select %8, %48, %49 : vector<16x16xi1>, vector<16x16xf32>
    %cst_16 = arith.constant dense<0xFF800000> : vector<16xf32>
    %51 = vector.multi_reduction <maximumf>, %50, %cst_16 [1] : vector<16x16xf32> to vector<16xf32>
    %52 = vector.shape_cast %51 : vector<16xf32> to vector<16x1xf32>
    %53 = vector.broadcast %52 : vector<16x1xf32> to vector<16x16xf32>
    %54 = arith.subf %50, %53 : vector<16x16xf32>
    %55 = math.exp %54 : vector<16x16xf32>
    %cst_17 = arith.constant dense<0.000000e+00> : vector<16xf32>
    %56 = vector.multi_reduction <add>, %55, %cst_17 [1] : vector<16x16xf32> to vector<16xf32>
    %57 = vector.shape_cast %56 : vector<16xf32> to vector<16x1xf32>
    %58 = arith.truncf %55 : vector<16x16xf32> to vector<16x16xbf16>
    %cst_18 = arith.constant dense<0.000000e+00> : vector<16x64xf32>
    %59 = tpu.matmul %58, %47, %cst_18 {dimension_numbers = #tpu.dot_dimension_numbers<[1], [0], [0], [1], [0, 0, 1, 1], [], []>} : vector<16x16xbf16>, vector<16x64xbf16>, vector<16x64xf32> -> vector<16x64xf32>
    %60 = tpu.reciprocal %57 {approx = true} : vector<16x1xf32> -> vector<16x1xf32>
    %61 = vector.broadcast %60 : vector<16x1xf32> to vector<16x64xf32>
    %62 = arith.mulf %59, %61 : vector<16x64xf32>
    %63 = vector.extract_strided_slice %5 {offsets = [0, 192], sizes = [16, 64], strides = [1, 1]} : vector<16x1152xbf16> to vector<16x64xbf16>
    %64 = vector.extract_strided_slice %5 {offsets = [0, 576], sizes = [16, 64], strides = [1, 1]} : vector<16x1152xbf16> to vector<16x64xbf16>
    %65 = vector.extract_strided_slice %5 {offsets = [0, 960], sizes = [16, 64], strides = [1, 1]} : vector<16x1152xbf16> to vector<16x64xbf16>
    %cst_19 = arith.constant dense<0.000000e+00> : vector<16x16xf32>
    %66 = tpu.matmul %63, %64, %cst_19 {dimension_numbers = #tpu.dot_dimension_numbers<[1], [1], [0], [0], [0, 0, 1, 0], [], []>} : vector<16x64xbf16>, vector<16x64xbf16>, vector<16x16xf32> -> vector<16x16xf32>
    %cst_20 = arith.constant -1.000000e+30 : f32
    %67 = vector.broadcast %cst_20 : f32 to vector<16x16xf32>
    %68 = arith.select %8, %66, %67 : vector<16x16xi1>, vector<16x16xf32>
    %cst_21 = arith.constant dense<0xFF800000> : vector<16xf32>
    %69 = vector.multi_reduction <maximumf>, %68, %cst_21 [1] : vector<16x16xf32> to vector<16xf32>
    %70 = vector.shape_cast %69 : vector<16xf32> to vector<16x1xf32>
    %71 = vector.broadcast %70 : vector<16x1xf32> to vector<16x16xf32>
    %72 = arith.subf %68, %71 : vector<16x16xf32>
    %73 = math.exp %72 : vector<16x16xf32>
    %cst_22 = arith.constant dense<0.000000e+00> : vector<16xf32>
    %74 = vector.multi_reduction <add>, %73, %cst_22 [1] : vector<16x16xf32> to vector<16xf32>
    %75 = vector.shape_cast %74 : vector<16xf32> to vector<16x1xf32>
    %76 = arith.truncf %73 : vector<16x16xf32> to vector<16x16xbf16>
    %cst_23 = arith.constant dense<0.000000e+00> : vector<16x64xf32>
    %77 = tpu.matmul %76, %65, %cst_23 {dimension_numbers = #tpu.dot_dimension_numbers<[1], [0], [0], [1], [0, 0, 1, 1], [], []>} : vector<16x16xbf16>, vector<16x64xbf16>, vector<16x64xf32> -> vector<16x64xf32>
    %78 = tpu.reciprocal %75 {approx = true} : vector<16x1xf32> -> vector<16x1xf32>
    %79 = vector.broadcast %78 : vector<16x1xf32> to vector<16x64xf32>
    %80 = arith.mulf %77, %79 : vector<16x64xf32>
    %81 = vector.extract_strided_slice %5 {offsets = [0, 256], sizes = [16, 64], strides = [1, 1]} : vector<16x1152xbf16> to vector<16x64xbf16>
    %82 = vector.extract_strided_slice %5 {offsets = [0, 640], sizes = [16, 64], strides = [1, 1]} : vector<16x1152xbf16> to vector<16x64xbf16>
    %83 = vector.extract_strided_slice %5 {offsets = [0, 1024], sizes = [16, 64], strides = [1, 1]} : vector<16x1152xbf16> to vector<16x64xbf16>
    %cst_24 = arith.constant dense<0.000000e+00> : vector<16x16xf32>
    %84 = tpu.matmul %81, %82, %cst_24 {dimension_numbers = #tpu.dot_dimension_numbers<[1], [1], [0], [0], [0, 0, 1, 0], [], []>} : vector<16x64xbf16>, vector<16x64xbf16>, vector<16x16xf32> -> vector<16x16xf32>
    %cst_25 = arith.constant -1.000000e+30 : f32
    %85 = vector.broadcast %cst_25 : f32 to vector<16x16xf32>
    %86 = arith.select %8, %84, %85 : vector<16x16xi1>, vector<16x16xf32>
    %cst_26 = arith.constant dense<0xFF800000> : vector<16xf32>
    %87 = vector.multi_reduction <maximumf>, %86, %cst_26 [1] : vector<16x16xf32> to vector<16xf32>
    %88 = vector.shape_cast %87 : vector<16xf32> to vector<16x1xf32>
    %89 = vector.broadcast %88 : vector<16x1xf32> to vector<16x16xf32>
    %90 = arith.subf %86, %89 : vector<16x16xf32>
    %91 = math.exp %90 : vector<16x16xf32>
    %cst_27 = arith.constant dense<0.000000e+00> : vector<16xf32>
    %92 = vector.multi_reduction <add>, %91, %cst_27 [1] : vector<16x16xf32> to vector<16xf32>
    %93 = vector.shape_cast %92 : vector<16xf32> to vector<16x1xf32>
    %94 = arith.truncf %91 : vector<16x16xf32> to vector<16x16xbf16>
    %cst_28 = arith.constant dense<0.000000e+00> : vector<16x64xf32>
    %95 = tpu.matmul %94, %83, %cst_28 {dimension_numbers = #tpu.dot_dimension_numbers<[1], [0], [0], [1], [0, 0, 1, 1], [], []>} : vector<16x16xbf16>, vector<16x64xbf16>, vector<16x64xf32> -> vector<16x64xf32>
    %96 = tpu.reciprocal %93 {approx = true} : vector<16x1xf32> -> vector<16x1xf32>
    %97 = vector.broadcast %96 : vector<16x1xf32> to vector<16x64xf32>
    %98 = arith.mulf %95, %97 : vector<16x64xf32>
    %99 = vector.extract_strided_slice %5 {offsets = [0, 320], sizes = [16, 64], strides = [1, 1]} : vector<16x1152xbf16> to vector<16x64xbf16>
    %100 = vector.extract_strided_slice %5 {offsets = [0, 704], sizes = [16, 64], strides = [1, 1]} : vector<16x1152xbf16> to vector<16x64xbf16>
    %101 = vector.extract_strided_slice %5 {offsets = [0, 1088], sizes = [16, 64], strides = [1, 1]} : vector<16x1152xbf16> to vector<16x64xbf16>
    %cst_29 = arith.constant dense<0.000000e+00> : vector<16x16xf32>
    %102 = tpu.matmul %99, %100, %cst_29 {dimension_numbers = #tpu.dot_dimension_numbers<[1], [1], [0], [0], [0, 0, 1, 0], [], []>} : vector<16x64xbf16>, vector<16x64xbf16>, vector<16x16xf32> -> vector<16x16xf32>
    %cst_30 = arith.constant -1.000000e+30 : f32
    %103 = vector.broadcast %cst_30 : f32 to vector<16x16xf32>
    %104 = arith.select %8, %102, %103 : vector<16x16xi1>, vector<16x16xf32>
    %cst_31 = arith.constant dense<0xFF800000> : vector<16xf32>
    %105 = vector.multi_reduction <maximumf>, %104, %cst_31 [1] : vector<16x16xf32> to vector<16xf32>
    %106 = vector.shape_cast %105 : vector<16xf32> to vector<16x1xf32>
    %107 = vector.broadcast %106 : vector<16x1xf32> to vector<16x16xf32>
    %108 = arith.subf %104, %107 : vector<16x16xf32>
    %109 = math.exp %108 : vector<16x16xf32>
    %cst_32 = arith.constant dense<0.000000e+00> : vector<16xf32>
    %110 = vector.multi_reduction <add>, %109, %cst_32 [1] : vector<16x16xf32> to vector<16xf32>
    %111 = vector.shape_cast %110 : vector<16xf32> to vector<16x1xf32>
    %112 = arith.truncf %109 : vector<16x16xf32> to vector<16x16xbf16>
    %cst_33 = arith.constant dense<0.000000e+00> : vector<16x64xf32>
    %113 = tpu.matmul %112, %101, %cst_33 {dimension_numbers = #tpu.dot_dimension_numbers<[1], [0], [0], [1], [0, 0, 1, 1], [], []>} : vector<16x16xbf16>, vector<16x64xbf16>, vector<16x64xf32> -> vector<16x64xf32>
    %114 = tpu.reciprocal %111 {approx = true} : vector<16x1xf32> -> vector<16x1xf32>
    %115 = vector.broadcast %114 : vector<16x1xf32> to vector<16x64xf32>
    %116 = arith.mulf %113, %115 : vector<16x64xf32>
    %117 = tpu.concatenate %26, %44, %62, %80, %98, %116 in 1 : vector<16x64xf32>, vector<16x64xf32>, vector<16x64xf32>, vector<16x64xf32>, vector<16x64xf32>, vector<16x64xf32> -> vector<16x384xf32>
    %118 = arith.truncf %117 : vector<16x384xf32> to vector<16x384xbf16>
    %c0_34 = arith.constant 0 : index
    %c0_35 = arith.constant 0 : index
    %119 = vector.load %arg3[%c0_34, %c0_35] : memref<384x384xbf16, #tpu.memory_space<vmem>>, vector<384x384xbf16>
    %cst_36 = arith.constant dense<0.000000e+00> : vector<16x384xf32>
    %120 = tpu.matmul %118, %119, %cst_36 {dimension_numbers = #tpu.dot_dimension_numbers<[1], [0], [0], [1], [0, 0, 1, 1], [], []>} : vector<16x384xbf16>, vector<384x384xbf16>, vector<16x384xf32> -> vector<16x384xf32>
    %c0_37 = arith.constant 0 : index
    %c0_38 = arith.constant 0 : index
    %121 = vector.load %arg4[%c0_37, %c0_38] : memref<1x384xf32, #tpu.memory_space<vmem>>, vector<1x384xf32>
    %122 = vector.broadcast %121 : vector<1x384xf32> to vector<16x384xf32>
    %123 = arith.addf %120, %122 : vector<16x384xf32>
    %c0_39 = arith.constant 0 : index
    %c0_40 = arith.constant 0 : index
    %c0_41 = arith.constant 0 : index
    %124 = vector.load %arg5[%c0_39, %c0_40, %c0_41] : memref<1x16x384xf32, #tpu.memory_space<vmem>>, vector<1x16x384xf32>
    %125 = vector.shape_cast %124 : vector<1x16x384xf32> to vector<16x384xf32>
    %126 = vector.shape_cast %123 : vector<16x384xf32> to vector<1x16x384xf32>
    tpu.vector_store %arg5[%c0_39, %c0_40, %c0_41], %126 {strides = array<i32>} : memref<1x16x384xf32, #tpu.memory_space<vmem>>, vector<1x16x384xf32>,
    return
  }
  func.func @transform_0(%arg0: i32) -> (i32, i32, i32) {
    %c0_i32 = arith.constant 0 : i32
    %c0_i32_0 = arith.constant 0 : i32
    %c0_i32_1 = arith.constant 0 : i32
    return %arg0, %c0_i32, %c0_i32_0 : i32, i32, i32
  }
  func.func @transform_1(%arg0: i32) -> (i32, i32) {
    %c0_i32 = arith.constant 0 : i32
    %c0_i32_0 = arith.constant 0 : i32
    %c0_i32_1 = arith.constant 0 : i32
    return %c0_i32, %c0_i32_0 : i32, i32
  }
  func.func @transform_2(%arg0: i32) -> (i32, i32) {
    %c0_i32 = arith.constant 0 : i32
    %c0_i32_0 = arith.constant 0 : i32
    %c0_i32_1 = arith.constant 0 : i32
    return %c0_i32, %c0_i32_0 : i32, i32
  }
  func.func @transform_3(%arg0: i32) -> (i32, i32) {
    %c0_i32 = arith.constant 0 : i32
    %c0_i32_0 = arith.constant 0 : i32
    %c0_i32_1 = arith.constant 0 : i32
    return %c0_i32, %c0_i32_0 : i32, i32
  }
  func.func @transform_4(%arg0: i32) -> (i32, i32, i32) {
    %c0_i32 = arith.constant 0 : i32
    %c0_i32_0 = arith.constant 0 : i32
    %c0_i32_1 = arith.constant 0 : i32
    return %arg0, %c0_i32, %c0_i32_0 : i32, i32, i32
  }
}

</mosaic_0001>

<bundles_post_ra>
// kernel: tpu_custom_call.1
= control target key start
LH: loop header
LB: loop body
LE: loop exit
PB: predicated region body
PF: predicated region fallthrough
CT: control target
= control target key end

     0   :  { %9 = vsyncpa [#allocation3], 0  ;;  %s5374_s0 = inlined_call_operand.hbm [shape: f32[2,16,384], index: 0, kind: input, shape index: {}]   ;;  %s5375_s1 = inlined_call_operand.hbm [shape: bf16[384,1152], index: 1, kind: input, shape index: {}]   ;;  %s5376_s2 = inlined_call_operand.hbm [shape: bf16[384,384], index: 2, kind: input, shape index: {}]   ;;  %s5377_s3 = inlined_call_operand.vmem [shape: f32[1,384], index: 3, kind: input, shape index: {}]   ;;  %s5378_s4 = inlined_call_operand.hbm [shape: f32[2,16,384], index: 4, kind: output, shape index: {}]  }
   0x1   :  { %11 = vsyncpa [#allocation3 + $0x1], 0 }
   0x2   :  { %12 = vsyncpa [#allocation6], 0 }
   0x3   :  { %13 = vsyncpa [#allocation4], 0 }
   0x4   :  { %15 = vsyncpa [#allocation4 + $0x1], 0  ;;  %s4866_s15 = smov 0   ;;  %s4868_s16 = smov 0  }
   0x5   :  { %s4870_s17 = smov 0   ;;  %s4872_s18 = smov 0  }
   0x6 LB: > { %s4887_s19 = sadd.s32 4294967295, %s4823_s18   ;;  %s3579_s20 = sadd.s32 4294967294, %s4823_s18   ;;  %s4823_s18 = sphi %s4872_s18, %s5402_s18   ;;  %s4819_s17 = sphi %s4870_s17, %s5401_s17   ;;  %s4815_s16 = sphi %s4868_s16, %s5400_s16   ;;  %s4811_s15 = sphi %s4866_s15, %s5399_s15  }
   0x7   : > { %p41_p0 = scmp.ne.s32.totalorder %s4815_s16, %s4811_s15  ;;  %p5379_p1 = scmp.eq.s32.totalorder %s4887_s19, 0 }
   0x8   : > { %p134_p3 = scmp.eq.s32.totalorder %s3579_s20, 1  ;;  %p3580_p5 = scmp.ge.s32.totalorder %s4823_s18, 1 }
   0x9   : > { %p4896_p4 = por %p5379_p1, %p41_p0  ;;  %p141_p7 = scmp.lt.s32.totalorder %s4823_s18, 3 }
   0xa   : > { %p4901_p6 = por %p134_p3, %p41_p0  ;;  %s4825_s24 = smov [#allocation5]  }
   0xb   : > { %s5382_s21 = scalar_select %p4896_p4, 1, 0 }
   0xc   : > { %s5383_s22 = scalar_select %p4901_p6, 1, 0 }
   0xd   : > { %p4906_p8 = pnand %p3580_p5, %p141_p7  ;;  %s153_s25 = sshll.u32 %s4825_s24, 4  ;;  %s4910_s25 = int_to_ptr.vmem [resolvable:$true] %s153_s25 }
   0xe   : > { %s4826_s27 = smov [#allocation7]   ;;  %s4667_s5 = scalar_lea.hbm %s5375_s1, 27648 }
   0xf   : > { %p4129_p9 = pneg %p4906_p8  ;;  %s166_s28 = sshll.u32 %s4826_s27, 4  ;;  %s4921_s28 = int_to_ptr.vmem [resolvable:$true] %s166_s28 }
  0x10   : > { %p4668_p12 = scmp.ne.s32.totalorder %s5375_s1, %s4667_s5  ;;  %p4674_p5 = scmp.lt.u32.totalorder %s4667_s5, %s5375_s1 }
  0x11   : > { %p4917_p11 = pnand %p4129_p9, %p5379_p1 }
  0x13   : > { %p4669_p13 = pneg %p4917_p11 }
  0x15   : > { %p4670_p0 = pnand %p4669_p13, %p4668_p12 }
  0x17   : > { %p4671_p3 = pneg %p4670_p0 }
  0x19   : > { %p4676_p7 = pnand %p4674_p5, %p4671_p3 }
  0x1b   : > { %4679 = shalt.err (!%p4676_p7)
}
  0x1c   : > { %s4680_s10 = scalar_lea.vmem %s4910_s25, 27648  ;;  %p4688_p2 = scmp.lt.s32.totalorder %s4910_s25, %s4910_s25 }
  0x1d   : > { %p4681_p9 = scmp.ne.s32.totalorder %s4910_s25, %s4680_s10  ;;  %p4689_p12 = scmp.lt.s32.totalorder %s4680_s10, %s4680_s10 }
  0x1f   : > { %p4683_p10 = pnand %p4681_p9, %p4669_p13  ;;  %p4690_p0 = por %p4689_p12, %p4688_p2 }
  0x21   : > { %p4684_p1 = pneg %p4683_p10 }
  0x23   : > { %p4691_p6 = pnand %p4690_p0, %p4684_p1 }
  0x25   : > { %4694 = shalt.err (!%p4691_p6)
}
  0x26   : > { %s4827_s11 = smov 576   ;;  %s4828_s12 = smov 36  }
  0x27   : > { %4132 = dma.hbm_to_vmem [thread:$0]  (!%p4917_p11), %s5375_s1, 27648, %s4910_s25, [#allocation6], %s4827_s11, %s4827_s11, %s4828_s12  }
  0x28   : > { %s4695_s27 = scalar_lea.hbm %s5376_s2, 9216 }
  0x29   : > { %p4696_p2 = scmp.ne.s32.totalorder %s5376_s2, %s4695_s27  ;;  %p4702_p10 = scmp.lt.u32.totalorder %s4695_s27, %s5376_s2 }
  0x2b   : > { %p4698_p1 = pnand %p4696_p2, %p4669_p13 }
  0x2d   : > { %p4699_p6 = pneg %p4698_p1 }
  0x2f   : > { %p4704_p3 = pnand %p4702_p10, %p4699_p6 }
  0x31   : > { %4707 = shalt.err (!%p4704_p3)
}
  0x32   : > { %s4708_s25 = scalar_lea.vmem %s4921_s28, 9216  ;;  %p4716_p12 = scmp.lt.s32.totalorder %s4921_s28, %s4921_s28 }
  0x33   : > { %p4709_p5 = scmp.ne.s32.totalorder %s4921_s28, %s4708_s25  ;;  %p4717_p0 = scmp.lt.s32.totalorder %s4708_s25, %s4708_s25 }
  0x35   : > { %p4711_p7 = pnand %p4709_p5, %p4669_p13  ;;  %p4718_p2 = por %p4717_p0, %p4716_p12 }
  0x37   : > { %p4712_p9 = pneg %p4711_p7 }
  0x39   : > { %p4719_p1 = pnand %p4718_p2, %p4712_p9 }
  0x3b   : > { %4722 = shalt.err (!%p4719_p1)
}
  0x3c   : > { %s4829_s7 = smov 192   ;;  %s4830_s8 = smov 12  }
  0x3d   : > { %4135 = dma.hbm_to_vmem [thread:$0]  (!%p4917_p11), %s5376_s2, 9216, %s4921_s28, [#allocation6], %s4829_s7, %s4829_s7, %s4830_s8  }
  0x3e   : > { %s4976_s11 = sadd.s32 1, %s4823_s18   ;;  %s28_s13 = sadd.s32 1, %s4819_s17 }
  0x3f   : > { %s25_s12 = ssub.s32 %s4823_s18, %s4976_s11  ;;  %p35_p6 = scmp.ne.s32.totalorder %s4819_s17, %s4815_s16 }
  0x40   : > { %p26_p13 = scmp.eq.s32.totalorder %s25_s12, 0  ;;  %p36_p10 = scmp.eq.s32.totalorder %s4823_s18, 0 }
  0x41   : > { %p5386_p5 = scmp.eq.s32.totalorder %s4887_s19, 1  ;;  %p4146_p9 = scmp.lt.s32.totalorder %s4823_s18, 2 }
  0x42   : > { %s4985_s14 = scalar_select %p26_p13, %s4819_s17, %s28_s13  }
  0x43   : > { %p37_p3 = por %p36_p10, %p35_p6  ;;  %p4989_p7 = por %p5386_p5, %p35_p6 }
  0x44   : > { %s183_s26 = sand.u32 1, %s4819_s17   ;;  %s4114_s28 = smul.u32 768, %s4823_s18 }
  0x45   : > { %s5387_s20 = scalar_select %p4989_p7, 1, 0 }
  0x46   : > { %s4113_s24 = smul.u32 48, %s183_s26  ;;  %p4996_p11 = pnand %p4146_p9, %p37_p3 }
  0x47   : > { %s5003_s5 = scalar_lea.hbm %s5374_s0, %s4114_s28  ;;  %s5007_s7 = scalar_lea.sflag [#allocation3], %s183_s26 }
  0x48   : > { %s187_s6 = scalar_lea.vmem [#allocation2], %s4113_s24  ;;  %s4723_s8 = scalar_lea.hbm %s5003_s5, 768 }
  0x49   : > { %s194_s25 = sshll.u32 %s187_s6, 4  ;;  %p4724_p12 = scmp.ne.s32.totalorder %s5003_s5, %s4723_s8  ;;  %s5005_s25 = int_to_ptr.vmem [resolvable:$true] %s194_s25 }
  0x4a   : > { %p4725_p0 = pneg %p4996_p11  ;;  %s4728_s12 = scalar_lea.hbm %s5374_s0, 1536 }
  0x4b   : > { %p4729_p13 = scmp.lt.u32.totalorder %s5003_s5, %s5374_s0  ;;  %p4730_p6 = scmp.lt.u32.totalorder %s4728_s12, %s4723_s8 }
  0x4c   : > { %p4726_p2 = pnand %p4725_p0, %p4724_p12  ;;  %p4732_p3 = scmp.lt.u32.totalorder %s4723_s8, %s5003_s5 }
  0x4d   : > { %p4731_p10 = por %p4730_p6, %p4729_p13 }
  0x4e   : > { %p4727_p1 = pneg %p4726_p2 }
  0x4f   : > { %p4733_p5 = por %p4732_p3, %p4731_p10 }
  0x51   : > { %p4734_p9 = pnand %p4733_p5, %p4727_p1 }
  0x53   : > { %4737 = shalt.err (!%p4734_p9)
}
  0x54   : > { %s4738_s26 = scalar_lea.vmem %s5005_s25, 768  ;;  %s4831_s24 = smov [#allocation2]  }
  0x55   : > { %p4739_p12 = scmp.ne.s32.totalorder %s5005_s25, %s4738_s26  ;;  %s4743_s29 = sshll.u32 %s4831_s24, 4  ;;  %s4744_s29 = int_to_ptr.vmem [resolvable:$false] %s4743_s29 }
  0x56   : > { %s4745_s30 = scalar_lea.vmem %s4744_s29, 1536  ;;  %p4746_p4 = scmp.lt.s32.totalorder %s5005_s25, %s4744_s29 }
  0x57   : > { %p4741_p2 = pnand %p4739_p12, %p4725_p0  ;;  %p4747_p13 = scmp.lt.s32.totalorder %s4745_s30, %s4738_s26 }
  0x59   : > { %p4742_p7 = pneg %p4741_p2  ;;  %p4748_p6 = por %p4747_p13, %p4746_p4 }
  0x5b   : > { %p4749_p10 = pnand %p4748_p6, %p4742_p7 }
  0x5d   : > { %4752 = shalt.err (!%p4749_p10)
}
  0x5e   : > { %s4832_s6 = smov 384   ;;  %s4833_s8 = smov 24  }
  0x5f   : > { %4139 = dma.hbm_to_vmem [thread:$0]  (!%p4996_p11), %s5003_s5, 768, %s5005_s25, %s5007_s7, %s4832_s6, %s4832_s6, %s4833_s8  }
  0x60   : > { %206 = sbr.rel (%p4906_p8) target bundleno = 1849 (0x739), region = 36  ;;  %s5038_s9 = sand.u32 (!%p4906_p8), 1, %s4815_s16  }
  0x61   : > { %s4115_s10 = smul.u32 (!%p4906_p8), 48, %s5038_s9  ;;  %s209_s12 = scalar_lea.sflag (!%p4906_p8), [#allocation3], %s5038_s9 }
  0x62   : > { %p5389_p4 = scmp.ne.s32.totalorder (!%p4906_p8), %s5382_s21, 0 }
  0x63   : > { %s5044_s13 = scalar_lea.vmem (!%p4906_p8), [#allocation2], %s4115_s10 }
  0x67   : > { %4798 = dma.done.wait (%p5389_p4), %s209_s12, 768  }
  0x68   : > { %4800 = vsyncadd (%p5389_p4), %s209_s12, 4294966528  ;;  %p5390_p7 = scmp.eq.s32.totalorder %s4887_s19, 0 }
  0x6a   : > { %4802 = dma.done.wait (%p5390_p7), [#allocation6], 36864   ;;  %p5391_p8 = pmov %p5390_p7 }
  0x6b   : > { %v4211_v0 = vld [vmem:[#allocation5 + $0x4] ss:$36 sps:$4 sm:$0xff]   ;;  %v4213_v1 = vld [vmem:[#allocation5 + $0xc] ss:$36 sps:$4 sm:$0xff]   ;;  %v4219_v5 = vld [vmem:[#allocation5 + $0x54] ss:$36 sps:$4 sm:$0xff]  }
  0x6c   : > { %4804 = vsyncadd (%p5391_p8), [#allocation6], 4294930432  ;;  %1599 = vmatprep.subr.bf16.mxu0 %v4211_v0  ;;  %v4215_v2 = vld [vmem:[#allocation5] ss:$36 sps:$4 sm:$0xff]   ;;  %v4216_v3 = vld [vmem:[#allocation5 + $0x8] ss:$36 sps:$4 sm:$0xff]   ;;  %1685 = vmatprep.subr.bf16.mxu1 %v4213_v1 }
  0x6d   : > { %v4217_v4 = vld [vmem:[#allocation5 + $0x4c] ss:$36 sps:$4 sm:$0xff]   ;;  %1600 = vmatpush1.bf16.msra.mxu0 %v4215_v2  ;;  %1686 = vmatpush1.bf16.msra.mxu1 %v4216_v3  ;;  %v4223_v8 = vld [vmem:[#allocation5 + $0x94] ss:$36 sps:$4 sm:$0xff]   ;;  %v4225_v9 = vld [vmem:[#allocation5 + $0x9c] ss:$36 sps:$4 sm:$0xff]  }
  0x6e   : > { %v4221_v6 = vld [vmem:[#allocation5 + $0x48] ss:$36 sps:$4 sm:$0xff]   ;;  %1601 = vmatprep.subr.bf16.mxu0 %v4217_v4  ;;  %v4222_v7 = vld [vmem:[#allocation5 + $0x50] ss:$36 sps:$4 sm:$0xff]   ;;  %1687 = vmatprep.subr.bf16.mxu1 %v4219_v5  ;;  %v4228_v11 = vld [vmem:[#allocation5 + $0x98] ss:$36 sps:$4 sm:$0xff]  }
  0x6f   : > { %v4227_v10 = vld [vmem:[#allocation5 + $0x90] ss:$36 sps:$4 sm:$0xff]   ;;  %v4229_v12 = vld [vmem:[#allocation5 + $0xdc] ss:$36 sps:$4 sm:$0xff]   ;;  %v4231_v13 = vld [vmem:[#allocation5 + $0xe4] ss:$36 sps:$4 sm:$0xff]  }
  0x70   : > { %v4233_v14 = vld [vmem:[#allocation5 + $0xd8] ss:$36 sps:$4 sm:$0xff]   ;;  %v4234_v15 = vld [vmem:[#allocation5 + $0xe0] ss:$36 sps:$4 sm:$0xff]   ;;  %v4237_v17 = vld [vmem:[#allocation5 + $0x12c] ss:$36 sps:$4 sm:$0xff]  }
  0x71   : > { %1602 = vmatpush1.bf16.msra.mxu0 %v4221_v6  ;;  %1688 = vmatpush1.bf16.msra.mxu1 %v4222_v7  ;;  %v4235_v16 = vld [vmem:[#allocation5 + $0x124] ss:$36 sps:$4 sm:$0xff]   ;;  %v4241_v20 = vld [vmem:[#allocation5 + $0x16c] ss:$36 sps:$4 sm:$0xff]   ;;  %v4243_v21 = vld [vmem:[#allocation5 + $0x174] ss:$36 sps:$4 sm:$0xff]  }
  0x72   : > { %1603 = vmatprep.subr.bf16.mxu0 %v4223_v8  ;;  %1689 = vmatprep.subr.bf16.mxu1 %v4225_v9  ;;  %v4239_v18 = vld [vmem:[#allocation5 + $0x120] ss:$36 sps:$4 sm:$0xff]   ;;  %v4240_v19 = vld [vmem:[#allocation5 + $0x128] ss:$36 sps:$4 sm:$0xff]   ;;  %v4246_v23 = vld [vmem:[#allocation5 + $0x170] ss:$36 sps:$4 sm:$0xff]  }
  0x73   : > { %v4245_v22 = vld [vmem:[#allocation5 + $0x168] ss:$36 sps:$4 sm:$0xff]   ;;  %v4247_v24 = vld [vmem:[#allocation5 + $0x1b4] ss:$36 sps:$4 sm:$0xff]   ;;  %v4249_v25 = vld [vmem:[#allocation5 + $0x1bc] ss:$36 sps:$4 sm:$0xff]  }
  0x74   : > { %v4251_v26 = vld [vmem:[#allocation5 + $0x1b0] ss:$36 sps:$4 sm:$0xff]   ;;  %v4252_v27 = vld [vmem:[#allocation5 + $0x1b8] ss:$36 sps:$4 sm:$0xff]   ;;  %v4255_v29 = vld [vmem:[#allocation5 + $0x204] ss:$36 sps:$4 sm:$0xff]  }
  0x75   : > { %1604 = vmatpush1.bf16.msra.mxu0 %v4227_v10  ;;  %1690 = vmatpush1.bf16.msra.mxu1 %v4228_v11  ;;  %v4253_v28 = vld [vmem:[#allocation5 + $0x1fc] ss:$36 sps:$4 sm:$0xff]   ;;  %v4259_v32 = vld [vmem:[#allocation5 + $0x244] ss:$36 sps:$4 sm:$0xff]   ;;  %v4261_v33 = vld [vmem:[#allocation5 + $0x24c] ss:$36 sps:$4 sm:$0xff]  }
  0x76   : > { %1605 = vmatprep.subr.bf16.mxu0 %v4229_v12  ;;  %1691 = vmatprep.subr.bf16.mxu1 %v4231_v13  ;;  %v4257_v30 = vld [vmem:[#allocation5 + $0x1f8] ss:$36 sps:$4 sm:$0xff]   ;;  %v4258_v31 = vld [vmem:[#allocation5 + $0x200] ss:$36 sps:$4 sm:$0xff]   ;;  %v4264_v35 = vld [vmem:[#allocation5 + $0x248] ss:$36 sps:$4 sm:$0xff]  }
  0x77   : > { %v4263_v34 = vld [vmem:[#allocation5 + $0x240] ss:$36 sps:$4 sm:$0xff]   ;;  %v4265_v36 = vld [vmem:[#allocation5 + $0x28c] ss:$36 sps:$4 sm:$0xff]   ;;  %v4267_v37 = vld [vmem:[#allocation5 + $0x294] ss:$36 sps:$4 sm:$0xff]  }
  0x78   : > { %v4269_v38 = vld [vmem:[#allocation5 + $0x288] ss:$36 sps:$4 sm:$0xff]   ;;  %v4270_v39 = vld [vmem:[#allocation5 + $0x290] ss:$36 sps:$4 sm:$0xff]   ;;  %v4273_v41 = vld [vmem:[#allocation5 + $0x2dc] ss:$36 sps:$4 sm:$0xff]  }
  0x79   : > { %1606 = vmatpush1.bf16.msra.mxu0 %v4233_v14  ;;  %1692 = vmatpush1.bf16.msra.mxu1 %v4234_v15  ;;  %v4271_v40 = vld [vmem:[#allocation5 + $0x2d4] ss:$36 sps:$4 sm:$0xff]   ;;  %v4277_v44 = vld [vmem:[#allocation5 + $0x31c] ss:$36 sps:$4 sm:$0xff]   ;;  %v4279_v45 = vld [vmem:[#allocation5 + $0x324] ss:$36 sps:$4 sm:$0xff]  }
  0x7a   : > { %1607 = vmatprep.subr.bf16.mxu0 %v4235_v16  ;;  %1693 = vmatprep.subr.bf16.mxu1 %v4237_v17  ;;  %v4275_v42 = vld [vmem:[#allocation5 + $0x2d0] ss:$36 sps:$4 sm:$0xff]   ;;  %v4276_v43 = vld [vmem:[#allocation5 + $0x2d8] ss:$36 sps:$4 sm:$0xff]   ;;  %v4282_v49 = vld [vmem:[#allocation5 + $0x320] ss:$36 sps:$4 sm:$0xff]  }
  0x7b   : > { %v247_v46 = vld [vmem:[%s5044_s13 + $0x8] sm:$0xff]  ;;  %v250_v47 = vld [vmem:[%s5044_s13 + $0x20] sm:$0xff]  ;;  %v249_v5 = vld [vmem:[%s5044_s13 + $0x18] sm:$0xff]  ;;  %v4834_v16 = vmov 0   ;;  %vm4836_vm0 = vmmov 0   ;;  %vm2041_vm1 = vcmask 523264  }
  0x7c   : > { %v4281_v48 = vld [vmem:[#allocation5 + $0x318] ss:$36 sps:$4 sm:$0xff]   ;;  %v5056_v50 = vpack.c.bf16 %v250_v47, %v247_v46  ;;  %v4283_v51 = vld [vmem:[#allocation5 + $0x364] ss:$36 sps:$4 sm:$0xff]   ;;  %v4285_v52 = vld [vmem:[#allocation5 + $0x36c] ss:$36 sps:$4 sm:$0xff]  }
  0x7d   : > { %1608 = vmatpush1.bf16.msra.mxu0 %v4239_v18  ;;  %1694 = vmatpush1.bf16.msra.mxu1 %v4240_v19  ;;  %v4287_v53 = vld [vmem:[#allocation5 + $0x360] ss:$36 sps:$4 sm:$0xff]   ;;  %v4288_v54 = vld [vmem:[#allocation5 + $0x368] ss:$36 sps:$4 sm:$0xff]   ;;  %v4291_v56 = vld [vmem:[#allocation5 + $0x3b4] ss:$36 sps:$4 sm:$0xff]  }
  0x7e   : > { %1609 = vmatprep.subr.bf16.mxu0 %v4241_v20  ;;  %1695 = vmatprep.subr.bf16.mxu1 %v4243_v21  ;;  %v4289_v55 = vld [vmem:[#allocation5 + $0x3ac] ss:$36 sps:$4 sm:$0xff]   ;;  %v4295_v59 = vld [vmem:[#allocation5 + $0x3f4] ss:$36 sps:$4 sm:$0xff]   ;;  %v4297_v60 = vld [vmem:[#allocation5 + $0x3fc] ss:$36 sps:$4 sm:$0xff]  }
  0x7f   : > { %1631 = vmatprep.mubr.bf16.mxu0 %v5056_v50  ;;  %1717 = vmatprep.mubr.bf16.mxu1 %v5056_v50  ;;  %v4293_v57 = vld [vmem:[#allocation5 + $0x3a8] ss:$36 sps:$4 sm:$0xff]   ;;  %v4294_v58 = vld [vmem:[#allocation5 + $0x3b0] ss:$36 sps:$4 sm:$0xff]   ;;  %v4300_v62 = vld [vmem:[#allocation5 + $0x3f8] ss:$36 sps:$4 sm:$0xff]  }
  0x80   : > { %v4299_v61 = vld [vmem:[#allocation5 + $0x3f0] ss:$36 sps:$4 sm:$0xff]   ;;  %v4301_v63 = vld [vmem:[#allocation5 + $0x43c] ss:$36 sps:$4 sm:$0xff]   ;;  %v4303_v0 = vld [vmem:[#allocation5 + $0x444] ss:$36 sps:$4 sm:$0xff]  }
  0x81   : > { %1610 = vmatpush1.bf16.msra.mxu0 %v4245_v22  ;;  %1696 = vmatpush1.bf16.msra.mxu1 %v4246_v23  ;;  %v4305_v1 = vld [vmem:[#allocation5 + $0x438] ss:$36 sps:$4 sm:$0xff]   ;;  %v4306_v2 = vld [vmem:[#allocation5 + $0x440] ss:$36 sps:$4 sm:$0xff]   ;;  %v4312_v6 = vld [vmem:[#allocation5 + $0x48c] ss:$36 sps:$4 sm:$0xff]  }
  0x82   : > { %1611 = vmatprep.subr.bf16.mxu0 %v4247_v24  ;;  %1697 = vmatprep.subr.bf16.mxu1 %v4249_v25  ;;  %v4309_v3 = vld [vmem:[#allocation5 + $0x484] ss:$36 sps:$4 sm:$0xff]   ;;  %v4315_v10 = vld [vmem:[#allocation5 + $0x4cc] ss:$36 sps:$4 sm:$0xff]   ;;  %v4318_v11 = vld [vmem:[#allocation5 + $0x4d4] ss:$36 sps:$4 sm:$0xff]  }
  0x83   : > { %v246_v4 = vld [vmem:[%s5044_s13] sm:$0xff]  ;;  %v4310_v9 = vld [vmem:[#allocation5 + $0x488] ss:$36 sps:$4 sm:$0xff]   ;;  %v4322_v18 = vld [vmem:[#allocation5 + $0x518] ss:$36 sps:$4 sm:$0xff]   ;;  %s4837_s21 = smov 64  }
  0x84   : > { %v4307_v7 = vld [vmem:[#allocation5 + $0x480] ss:$36 sps:$4 sm:$0xff]   ;;  %v5062_v8 = vpack.c.bf16 %v249_v5, %v246_v4  ;;  %v4313_v12 = vld [vmem:[#allocation5 + $0x4c8] ss:$36 sps:$4 sm:$0xff]   ;;  %v4316_v13 = vld [vmem:[#allocation5 + $0x4d0] ss:$36 sps:$4 sm:$0xff]  }
  0x85   : > { %1612 = vmatpush1.bf16.msra.mxu0 %v4251_v26  ;;  %1698 = vmatpush1.bf16.msra.mxu1 %v4252_v27  ;;  %v4321_v14 = vld [vmem:[#allocation5 + $0x514] ss:$36 sps:$4 sm:$0xff]   ;;  %v4324_v15 = vld [vmem:[#allocation5 + $0x51c] ss:$36 sps:$4 sm:$0xff]   ;;  %v4330_v20 = vld [vmem:[#allocation5 + $0x564] ss:$36 sps:$4 sm:$0xff]  }
  0x86   : > { %1613 = vmatprep.subr.bf16.mxu0 %v4253_v28  ;;  %1699 = vmatprep.subr.bf16.mxu1 %v4255_v29  ;;  %v4319_v17 = vld [vmem:[#allocation5 + $0x510] ss:$36 sps:$4 sm:$0xff]   ;;  %v4327_v19 = vld [vmem:[#allocation5 + $0x55c] ss:$36 sps:$4 sm:$0xff]   ;;  %v4333_v23 = vld [vmem:[#allocation5 + $0x5a4] ss:$36 sps:$4 sm:$0xff]  }
  0x87   : > { %v4325_v21 = vld [vmem:[#allocation5 + $0x558] ss:$36 sps:$4 sm:$0xff]   ;;  %v4328_v22 = vld [vmem:[#allocation5 + $0x560] ss:$36 sps:$4 sm:$0xff]   ;;  %v4336_v24 = vld [vmem:[#allocation5 + $0x5ac] ss:$36 sps:$4 sm:$0xff]  }
  0x88   : > { %v4331_v25 = vld [vmem:[#allocation5 + $0x5a0] ss:$36 sps:$4 sm:$0xff]   ;;  %v4334_v26 = vld [vmem:[#allocation5 + $0x5a8] ss:$36 sps:$4 sm:$0xff]   ;;  %v4342_v28 = vld [vmem:[#allocation5 + $0x5f4] ss:$36 sps:$4 sm:$0xff]  }
  0x89   : > { %1614 = vmatpush1.bf16.msra.mxu0 %v4257_v30  ;;  %1700 = vmatpush1.bf16.msra.mxu1 %v4258_v31  ;;  %v4339_v27 = vld [vmem:[#allocation5 + $0x5ec] ss:$36 sps:$4 sm:$0xff]   ;;  %v4345_v31 = vld [vmem:[#allocation5 + $0x634] ss:$36 sps:$4 sm:$0xff]   ;;  %v4360_v46 = vld [vmem:[#allocation5 + $0x5c] ss:$36 sps:$4 sm:$0xff]  }
  0x8a   : > { %1615 = vmatprep.subr.bf16.mxu0 %v4259_v32  ;;  %1701 = vmatprep.subr.bf16.mxu1 %v4261_v33  ;;  %v4337_v29 = vld [vmem:[#allocation5 + $0x5e8] ss:$36 sps:$4 sm:$0xff]   ;;  %v4340_v30 = vld [vmem:[#allocation5 + $0x5f0] ss:$36 sps:$4 sm:$0xff]   ;;  %v4348_v32 = vld [vmem:[#allocation5 + $0x63c] ss:$36 sps:$4 sm:$0xff]  }
  0x8b   : > { %v4343_v33 = vld [vmem:[#allocation5 + $0x630] ss:$36 sps:$4 sm:$0xff]   ;;  %v4402_v47 = vld [vmem:[#allocation5 + $0x64] ss:$36 sps:$4 sm:$0xff]   ;;  %vm2091_vm3 = vcmask 130048   ;;  %s244_s5 = scalar_lea.vmem [#allocation8], %s4115_s10 }
  0x8c   : > { %v4432_v4 = vld [vmem:[#allocation5 + $0x1cc] ss:$36 sps:$4 sm:$0xff]   ;;  %v4373_v5 = vld [vmem:[#allocation5 + $0x1c0] ss:$36 sps:$4 sm:$0xff]   ;;  %s3487_s25 = sshll.u32 %s244_s5, 4  ;;  %s4116_s7 = smul.u32 768, %s4887_s19  ;;  %s5325_s25 = int_to_ptr.vmem [resolvable:$true] %s3487_s25 }
  0x8d   : > { %1616 = vmatpush1.bf16.msra.mxu0 %v4263_v34  ;;  %1702 = vmatpush1.bf16.msra.mxu1 %v4264_v35  ;;  %v4346_v34 = vld [vmem:[#allocation5 + $0x638] ss:$36 sps:$4 sm:$0xff]   ;;  %s3474_s24 = scalar_lea.sflag [#allocation4], %s5038_s9  ;;  %s4753_s29 = scalar_lea.vmem %s5325_s25, 768 }
  0x8e   : > { %1617 = vmatprep.subr.bf16.mxu0 %v4265_v36  ;;  %1703 = vmatprep.subr.bf16.mxu1 %v4267_v37  ;;  %v4351_v35 = vld [vmem:[#allocation5 + $0x67c] ss:$36 sps:$4 sm:$0xff]   ;;  %v4354_v36 = vld [vmem:[#allocation5 + $0x684] ss:$36 sps:$4 sm:$0xff]   ;;  %s5330_s26 = scalar_lea.hbm %s5378_s4, %s4116_s7  ;;  %p4754_p11 = scmp.ne.s32.totalorder %s5325_s25, %s4753_s29 }
  0x8f   : > { %v4349_v37 = vld [vmem:[#allocation5 + $0x678] ss:$36 sps:$4 sm:$0xff]   ;;  %p5396_p0 = scmp.ne.s32.totalorder %s5387_s20, 0  ;;  %s4838_s30 = smov [#allocation8]  }
  0x90   : > { %s4757_s6 = sshll.u32 %s4838_s30, 4  ;;  %s4758_s6 = int_to_ptr.vmem [resolvable:$false] %s4757_s6 }
  0x91   : > { %1618 = vmatpush1.bf16.msra.mxu0 %v4269_v38  ;;  %1704 = vmatpush1.bf16.msra.mxu1 %v4270_v39  ;;  %v4352_v38 = vld [vmem:[#allocation5 + $0x680] ss:$36 sps:$4 sm:$0xff]   ;;  %p4755_p1 = pnand %p4754_p11, %p5396_p0  ;;  %s4759_s8 = scalar_lea.vmem %s4758_s6, 1536 }
  0x92   : > { %1619 = vmatprep.subr.bf16.mxu0 %v4271_v40  ;;  %1705 = vmatprep.subr.bf16.mxu1 %v4273_v41  ;;  %v248_v39 = vld [vmem:[%s5044_s13 + $0x10] sm:$0xff]  ;;  %v251_v40 = vld [vmem:[%s5044_s13 + $0x28] sm:$0xff]  ;;  %p4760_p5 = scmp.lt.s32.totalorder %s5325_s25, %s4758_s6  ;;  %p4761_p9 = scmp.lt.s32.totalorder %s4759_s8, %s4753_s29 }
  0x93   : > { %v4357_v41 = vld [vmem:[#allocation5 + $0x14] ss:$36 sps:$4 sm:$0xff]   ;;  %p4756_p3 = pneg %p4755_p1 }
  0x94   : > { %p4762_p12 = por %p4761_p9, %p4760_p5 }
  0x95   : > { %1620 = vmatpush1.bf16.msra.mxu0 %v4275_v42  ;;  %1706 = vmatpush1.bf16.msra.mxu1 %v4276_v43  ;;  %v4396_v42 = vld [vmem:[#allocation5 + $0x1c] ss:$36 sps:$4 sm:$0xff]   ;;  %v5070_v43 = vpack.c.bf16 %v251_v40, %v248_v39  ;;  %v4411_v40 = vld [vmem:[#allocation5 + $0x44c] ss:$36 sps:$4 sm:$0xff]  }
  0x96   : > { %1621 = vmatprep.subr.bf16.mxu0 %v4277_v44  ;;  %1707 = vmatprep.subr.bf16.mxu1 %v4279_v45  ;;  %v4355_v44 = vld [vmem:[#allocation5 + $0x10] ss:$36 sps:$4 sm:$0xff]   ;;  %v4394_v45 = vld [vmem:[#allocation5 + $0x18] ss:$36 sps:$4 sm:$0xff]   ;;  %v4403_v39 = vld [vmem:[#allocation5 + $0x400] ss:$36 sps:$4 sm:$0xff]   ;;  %p4763_p2 = pnand %p4762_p12, %p4756_p3 }
  0x99   : > { %1622 = vmatpush1.bf16.msra.mxu0 %v4281_v48  ;;  %1708 = vmatpush1.bf16.msra.mxu1 %v4282_v49  ;;  %v4358_v48 = vld [vmem:[#allocation5 + $0x58] ss:$36 sps:$4 sm:$0xff]   ;;  %v4400_v49 = vld [vmem:[#allocation5 + $0x60] ss:$36 sps:$4 sm:$0xff]  }
  0x9a   : > { %1623 = vmatprep.subr.bf16.mxu0 %v4283_v51  ;;  %1709 = vmatprep.subr.bf16.mxu1 %v4285_v52  ;;  %v4363_v51 = vld [vmem:[#allocation5 + $0xa4] ss:$36 sps:$4 sm:$0xff]   ;;  %v4408_v52 = vld [vmem:[#allocation5 + $0xac] ss:$36 sps:$4 sm:$0xff]  }
  0x9d   : > { %1624 = vmatpush1.bf16.msra.mxu0 %v4287_v53  ;;  %1710 = vmatpush1.bf16.msra.mxu1 %v4288_v54  ;;  %v4361_v53 = vld [vmem:[#allocation5 + $0xa0] ss:$36 sps:$4 sm:$0xff]   ;;  %v4406_v54 = vld [vmem:[#allocation5 + $0xa8] ss:$36 sps:$4 sm:$0xff]  }
  0x9e   : > { %1625 = vmatprep.subr.bf16.mxu0 %v4289_v55  ;;  %1711 = vmatprep.subr.bf16.mxu1 %v4291_v56  ;;  %v4366_v55 = vld [vmem:[#allocation5 + $0xec] ss:$36 sps:$4 sm:$0xff]   ;;  %v4414_v56 = vld [vmem:[#allocation5 + $0xf4] ss:$36 sps:$4 sm:$0xff]  }
  0xa1   : > { %1626 = vmatpush1.bf16.msra.mxu0 %v4293_v57  ;;  %1712 = vmatpush1.bf16.msra.mxu1 %v4294_v58  ;;  %v4364_v57 = vld [vmem:[#allocation5 + $0xe8] ss:$36 sps:$4 sm:$0xff]   ;;  %v4412_v58 = vld [vmem:[#allocation5 + $0xf0] ss:$36 sps:$4 sm:$0xff]  }
  0xa2   : > { %1627 = vmatprep.subr.bf16.mxu0 %v4295_v59  ;;  %1713 = vmatprep.subr.bf16.mxu1 %v4297_v60  ;;  %v4369_v59 = vld [vmem:[#allocation5 + $0x134] ss:$36 sps:$4 sm:$0xff]   ;;  %v4420_v60 = vld [vmem:[#allocation5 + $0x13c] ss:$36 sps:$4 sm:$0xff]  }
  0xa5   : > { %1628 = vmatpush1.bf16.msra.mxu0 %v4299_v61  ;;  %1714 = vmatpush1.bf16.msra.mxu1 %v4300_v62  ;;  %v4367_v61 = vld [vmem:[#allocation5 + $0x130] ss:$36 sps:$4 sm:$0xff]   ;;  %v4418_v62 = vld [vmem:[#allocation5 + $0x138] ss:$36 sps:$4 sm:$0xff]  }
  0xa6   : > { %1629 = vmatprep.subr.bf16.mxu0 %v4301_v63  ;;  %1715 = vmatprep.subr.bf16.mxu1 %v4303_v0  ;;  %v4372_v63 = vld [vmem:[#allocation5 + $0x17c] ss:$36 sps:$4 sm:$0xff]   ;;  %v4426_v0 = vld [vmem:[#allocation5 + $0x184] ss:$36 sps:$4 sm:$0xff]  }
  0xa9   : > { %1630 = vmatpush1.bf16.msra.mxu0 %v4305_v1  ;;  %1716 = vmatpush1.bf16.msra.mxu1 %v4306_v2  ;;  %v4370_v1 = vld [vmem:[#allocation5 + $0x178] ss:$36 sps:$4 sm:$0xff]   ;;  %v4424_v2 = vld [vmem:[#allocation5 + $0x180] ss:$36 sps:$4 sm:$0xff]  }
  0xaa   : > { %1642 = vmatprep.subr.bf16.mxu0 %v4309_v3  ;;  %1728 = vmatprep.subr.bf16.mxu1 %v4312_v6  ;;  %v4375_v3 = vld [vmem:[#allocation5 + $0x1c4] ss:$36 sps:$4 sm:$0xff]  }
  0xab   : > { %v4430_v6 = vld [vmem:[#allocation5 + $0x1c8] ss:$36 sps:$4 sm:$0xff]  }
  0xac   : > { %1632 = vmatmul.mubr.bf16.vlgmr.msra.gmra.mrb[0].mxu0 %v5062_v8  ;;  %1718 = vmatmul.mubr.bf16.vlgmr.msra.gmra.mrb[0].mxu1 %v5062_v8 }
  0xad   : > { %1643 = vmatpush1.bf16.msra.mxu0 %v4307_v7  ;;  %1729 = vmatpush1.bf16.msra.mxu1 %v4310_v9  ;;  %v4378_v7 = vld [vmem:[#allocation5 + $0x20c] ss:$36 sps:$4 sm:$0xff]   ;;  %v4438_v9 = vld [vmem:[#allocation5 + $0x214] ss:$36 sps:$4 sm:$0xff]  }
  0xae   : > { %1644 = vmatprep.subr.bf16.mxu0 %v4315_v10  ;;  %1730 = vmatprep.subr.bf16.mxu1 %v4318_v11  ;;  %v4376_v10 = vld [vmem:[#allocation5 + $0x208] ss:$36 sps:$4 sm:$0xff]   ;;  %v4436_v11 = vld [vmem:[#allocation5 + $0x210] ss:$36 sps:$4 sm:$0xff]  }
  0xaf   : > { %1674 = vmatprep.mubr.bf16.mxu0 %v4834_v16  ;;  %1760 = vmatprep.mubr.bf16.mxu1 %v4834_v16 }
  0xb1   : > { %1645 = vmatpush1.bf16.msra.mxu0 %v4313_v12  ;;  %1731 = vmatpush1.bf16.msra.mxu1 %v4316_v13  ;;  %v4381_v12 = vld [vmem:[#allocation5 + $0x254] ss:$36 sps:$4 sm:$0xff]   ;;  %v4444_v13 = vld [vmem:[#allocation5 + $0x25c] ss:$36 sps:$4 sm:$0xff]  }
  0xb2   : > { %1646 = vmatprep.subr.bf16.mxu0 %v4321_v14  ;;  %1732 = vmatprep.subr.bf16.mxu1 %v4324_v15  ;;  %v4379_v14 = vld [vmem:[#allocation5 + $0x250] ss:$36 sps:$4 sm:$0xff]   ;;  %v4442_v15 = vld [vmem:[#allocation5 + $0x258] ss:$36 sps:$4 sm:$0xff]  }
  0xb5   : > { %1647 = vmatpush1.bf16.msra.mxu0 %v4319_v17  ;;  %1733 = vmatpush1.bf16.msra.mxu1 %v4322_v18  ;;  %v4384_v17 = vld [vmem:[#allocation5 + $0x29c] ss:$36 sps:$4 sm:$0xff]   ;;  %v4450_v18 = vld [vmem:[#allocation5 + $0x2a4] ss:$36 sps:$4 sm:$0xff]  }
  0xb6   : > { %1648 = vmatprep.subr.bf16.mxu0 %v4327_v19  ;;  %1734 = vmatprep.subr.bf16.mxu1 %v4330_v20  ;;  %v4382_v19 = vld [vmem:[#allocation5 + $0x298] ss:$36 sps:$4 sm:$0xff]   ;;  %v4387_v20 = vld [vmem:[#allocation5 + $0x2e4] ss:$36 sps:$4 sm:$0xff]  }
  0xb9   : > { %1649 = vmatpush1.bf16.msra.mxu0 %v4325_v21  ;;  %1735 = vmatpush1.bf16.msra.mxu1 %v4328_v22  ;;  %v4448_v21 = vld [vmem:[#allocation5 + $0x2a0] ss:$36 sps:$4 sm:$0xff]   ;;  %v4456_v22 = vld [vmem:[#allocation5 + $0x2ec] ss:$36 sps:$4 sm:$0xff]  }
  0xba   : > { %1650 = vmatprep.subr.bf16.mxu0 %v4333_v23  ;;  %1736 = vmatprep.subr.bf16.mxu1 %v4336_v24  ;;  %v4385_v23 = vld [vmem:[#allocation5 + $0x2e0] ss:$36 sps:$4 sm:$0xff]   ;;  %v4390_v24 = vld [vmem:[#allocation5 + $0x32c] ss:$36 sps:$4 sm:$0xff]  }
  0xbd   : > { %1651 = vmatpush1.bf16.msra.mxu0 %v4331_v25  ;;  %1737 = vmatpush1.bf16.msra.mxu1 %v4334_v26  ;;  %v4454_v25 = vld [vmem:[#allocation5 + $0x2e8] ss:$36 sps:$4 sm:$0xff]   ;;  %v4462_v26 = vld [vmem:[#allocation5 + $0x334] ss:$36 sps:$4 sm:$0xff]  }
  0xbe   : > { %1652 = vmatprep.subr.bf16.mxu0 %v4339_v27  ;;  %1738 = vmatprep.subr.bf16.mxu1 %v4342_v28  ;;  %v4388_v27 = vld [vmem:[#allocation5 + $0x328] ss:$36 sps:$4 sm:$0xff]   ;;  %v4393_v28 = vld [vmem:[#allocation5 + $0x374] ss:$36 sps:$4 sm:$0xff]  }
  0xc1   : > { %1653 = vmatpush1.bf16.msra.mxu0 %v4337_v29  ;;  %1739 = vmatpush1.bf16.msra.mxu1 %v4340_v30  ;;  %v4460_v29 = vld [vmem:[#allocation5 + $0x330] ss:$36 sps:$4 sm:$0xff]   ;;  %v4465_v30 = vld [vmem:[#allocation5 + $0x37c] ss:$36 sps:$4 sm:$0xff]  }
  0xc2   : > { %1654 = vmatprep.subr.bf16.mxu0 %v4345_v31  ;;  %1740 = vmatprep.subr.bf16.mxu1 %v4348_v32  ;;  %v4391_v31 = vld [vmem:[#allocation5 + $0x370] ss:$36 sps:$4 sm:$0xff]   ;;  %v4399_v32 = vld [vmem:[#allocation5 + $0x3bc] ss:$36 sps:$4 sm:$0xff]  }
  0xc5   : > { %1655 = vmatpush1.bf16.msra.mxu0 %v4343_v33  ;;  %1741 = vmatpush1.bf16.msra.mxu1 %v4346_v34  ;;  %v4463_v33 = vld [vmem:[#allocation5 + $0x378] ss:$36 sps:$4 sm:$0xff]   ;;  %v4468_v34 = vld [vmem:[#allocation5 + $0x3c4] ss:$36 sps:$4 sm:$0xff]  }
  0xc6   : > { %1656 = vmatprep.subr.bf16.mxu0 %v4351_v35  ;;  %1742 = vmatprep.subr.bf16.mxu1 %v4354_v36  ;;  %v4397_v35 = vld [vmem:[#allocation5 + $0x3b8] ss:$36 sps:$4 sm:$0xff]   ;;  %v4405_v36 = vld [vmem:[#allocation5 + $0x404] ss:$36 sps:$4 sm:$0xff]  }
  0xc9   : > { %1657 = vmatpush1.bf16.msra.mxu0 %v4349_v37  ;;  %1743 = vmatpush1.bf16.msra.mxu1 %v4352_v38  ;;  %v4466_v37 = vld [vmem:[#allocation5 + $0x3c0] ss:$36 sps:$4 sm:$0xff]   ;;  %v4471_v38 = vld [vmem:[#allocation5 + $0x40c] ss:$36 sps:$4 sm:$0xff]  }
  0xca   : > { %1771 = vmatprep.subr.bf16.mxu0 %v4357_v41  ;;  %1857 = vmatprep.subr.bf16.mxu1 %v4396_v42  ;;  %v4469_v41 = vld [vmem:[#allocation5 + $0x408] ss:$36 sps:$4 sm:$0xff]   ;;  %v4474_v42 = vld [vmem:[#allocation5 + $0x454] ss:$36 sps:$4 sm:$0xff]  }
  0xcc   : > { %1675 = vmatmul.mubr.bf16.vlgmr.msra.gmra.mrb[0].mxu0 %v5070_v43  ;;  %1761 = vmatmul.mubr.bf16.vlgmr.msra.gmra.mrb[0].mxu1 %v5070_v43 }
  0xcd   : > { %1772 = vmatpush1.bf16.msra.mxu0 %v4355_v44  ;;  %1858 = vmatpush1.bf16.msra.mxu1 %v4394_v45  ;;  %v4409_v44 = vld [vmem:[#allocation5 + $0x448] ss:$36 sps:$4 sm:$0xff]   ;;  %v4472_v45 = vld [vmem:[#allocation5 + $0x450] ss:$36 sps:$4 sm:$0xff]  }
  0xce   : > { %1773 = vmatprep.subr.bf16.mxu0 %v4360_v46  ;;  %1859 = vmatprep.subr.bf16.mxu1 %v4402_v47  ;;  %v4417_v46 = vld [vmem:[#allocation5 + $0x494] ss:$36 sps:$4 sm:$0xff]   ;;  %v4477_v47 = vld [vmem:[#allocation5 + $0x49c] ss:$36 sps:$4 sm:$0xff]  }
  0xcf   : > { %1803 = vmatprep.mubr.bf16.mxu0 %v5056_v50  ;;  %1889 = vmatprep.mubr.bf16.mxu1 %v5056_v50 }
  0xd1   : > { %1774 = vmatpush1.bf16.msra.mxu0 %v4358_v48  ;;  %1860 = vmatpush1.bf16.msra.mxu1 %v4400_v49  ;;  %v4415_v48 = vld [vmem:[#allocation5 + $0x490] ss:$36 sps:$4 sm:$0xff]   ;;  %v4423_v49 = vld [vmem:[#allocation5 + $0x4dc] ss:$36 sps:$4 sm:$0xff]  }
  0xd2   : > { %1775 = vmatprep.subr.bf16.mxu0 %v4363_v51  ;;  %1861 = vmatprep.subr.bf16.mxu1 %v4408_v52  ;;  %v4475_v51 = vld [vmem:[#allocation5 + $0x498] ss:$36 sps:$4 sm:$0xff]   ;;  %v4480_v52 = vld [vmem:[#allocation5 + $0x4e4] ss:$36 sps:$4 sm:$0xff]  }
  0xd5   : > { %1776 = vmatpush1.bf16.msra.mxu0 %v4361_v53  ;;  %1862 = vmatpush1.bf16.msra.mxu1 %v4406_v54  ;;  %v4421_v53 = vld [vmem:[#allocation5 + $0x4d8] ss:$36 sps:$4 sm:$0xff]   ;;  %v4429_v54 = vld [vmem:[#allocation5 + $0x524] ss:$36 sps:$4 sm:$0xff]  }
  0xd6   : > { %1777 = vmatprep.subr.bf16.mxu0 %v4366_v55  ;;  %1863 = vmatprep.subr.bf16.mxu1 %v4414_v56  ;;  %v4478_v55 = vld [vmem:[#allocation5 + $0x4e0] ss:$36 sps:$4 sm:$0xff]   ;;  %v4483_v56 = vld [vmem:[#allocation5 + $0x52c] ss:$36 sps:$4 sm:$0xff]  }
  0xd9   : > { %1778 = vmatpush1.bf16.msra.mxu0 %v4364_v57  ;;  %1864 = vmatpush1.bf16.msra.mxu1 %v4412_v58  ;;  %v4427_v57 = vld [vmem:[#allocation5 + $0x520] ss:$36 sps:$4 sm:$0xff]   ;;  %v4435_v58 = vld [vmem:[#allocation5 + $0x56c] ss:$36 sps:$4 sm:$0xff]  }
  0xda   : > { %1779 = vmatprep.subr.bf16.mxu0 %v4369_v59  ;;  %1865 = vmatprep.subr.bf16.mxu1 %v4420_v60  ;;  %v4481_v59 = vld [vmem:[#allocation5 + $0x528] ss:$36 sps:$4 sm:$0xff]   ;;  %v4486_v60 = vld [vmem:[#allocation5 + $0x574] ss:$36 sps:$4 sm:$0xff]  }
  0xdd   : > { %1780 = vmatpush1.bf16.msra.mxu0 %v4367_v61  ;;  %1866 = vmatpush1.bf16.msra.mxu1 %v4418_v62  ;;  %v4433_v61 = vld [vmem:[#allocation5 + $0x568] ss:$36 sps:$4 sm:$0xff]   ;;  %v4441_v62 = vld [vmem:[#allocation5 + $0x5b4] ss:$36 sps:$4 sm:$0xff]  }
  0xde   : > { %1781 = vmatprep.subr.bf16.mxu0 %v4372_v63  ;;  %1867 = vmatprep.subr.bf16.mxu1 %v4426_v0  ;;  %v4484_v63 = vld [vmem:[#allocation5 + $0x570] ss:$36 sps:$4 sm:$0xff]   ;;  %v4489_v0 = vld [vmem:[#allocation5 + $0x5bc] ss:$36 sps:$4 sm:$0xff]  }
  0xe1   : > { %1782 = vmatpush1.bf16.msra.mxu0 %v4370_v1  ;;  %1868 = vmatpush1.bf16.msra.mxu1 %v4424_v2  ;;  %v4439_v1 = vld [vmem:[#allocation5 + $0x5b0] ss:$36 sps:$4 sm:$0xff]   ;;  %v4447_v2 = vld [vmem:[#allocation5 + $0x5fc] ss:$36 sps:$4 sm:$0xff]  }
  0xe2   : > { %1783 = vmatprep.subr.bf16.mxu0 %v4375_v3  ;;  %1869 = vmatprep.subr.bf16.mxu1 %v4432_v4  ;;  %v4487_v3 = vld [vmem:[#allocation5 + $0x5b8] ss:$36 sps:$4 sm:$0xff]   ;;  %v4492_v4 = vld [vmem:[#allocation5 + $0x604] ss:$36 sps:$4 sm:$0xff]  }
  0xe5   : > { %1784 = vmatpush1.bf16.msra.mxu0 %v4373_v5  ;;  %1870 = vmatpush1.bf16.msra.mxu1 %v4430_v6  ;;  %v4445_v5 = vld [vmem:[#allocation5 + $0x5f8] ss:$36 sps:$4 sm:$0xff]   ;;  %v4453_v6 = vld [vmem:[#allocation5 + $0x644] ss:$36 sps:$4 sm:$0xff]  }
  0xe6   : > { %1785 = vmatprep.subr.bf16.mxu0 %v4378_v7  ;;  %1871 = vmatprep.subr.bf16.mxu1 %v4438_v9  ;;  %v4490_v7 = vld [vmem:[#allocation5 + $0x600] ss:$36 sps:$4 sm:$0xff]   ;;  %v4495_v9 = vld [vmem:[#allocation5 + $0x64c] ss:$36 sps:$4 sm:$0xff]  }
  0xe9   : > { %1786 = vmatpush1.bf16.msra.mxu0 %v4376_v10  ;;  %1872 = vmatpush1.bf16.msra.mxu1 %v4436_v11  ;;  %v4451_v10 = vld [vmem:[#allocation5 + $0x640] ss:$36 sps:$4 sm:$0xff]   ;;  %v4459_v11 = vld [vmem:[#allocation5 + $0x68c] ss:$36 sps:$4 sm:$0xff]  }
  0xea   : > { %1787 = vmatprep.subr.bf16.mxu0 %v4381_v12  ;;  %1873 = vmatprep.subr.bf16.mxu1 %v4444_v13  ;;  %v4493_v12 = vld [vmem:[#allocation5 + $0x648] ss:$36 sps:$4 sm:$0xff]   ;;  %v4498_v13 = vld [vmem:[#allocation5 + $0x694] ss:$36 sps:$4 sm:$0xff]  }
  0xed   : > { %1788 = vmatpush1.bf16.msra.mxu0 %v4379_v14  ;;  %1874 = vmatpush1.bf16.msra.mxu1 %v4442_v15  ;;  %v4457_v14 = vld [vmem:[#allocation5 + $0x688] ss:$36 sps:$4 sm:$0xff]   ;;  %v4496_v15 = vld [vmem:[#allocation5 + $0x690] ss:$36 sps:$4 sm:$0xff]  }
  0xee   : > { %1789 = vmatprep.subr.bf16.mxu0 %v4384_v17  ;;  %1875 = vmatprep.subr.bf16.mxu1 %v4450_v18  ;;  %v4499_v17 = vld [vmem:[#allocation5 + $0x260] ss:$36 sps:$4 sm:$0xff]  }
  0xef   : > { %v4501_v18 = vld [vmem:[#allocation5 + $0x20] ss:$36 sps:$4 sm:$0xff]  }
  0xf1   : > { %1790 = vmatpush1.bf16.msra.mxu0 %v4382_v19  ;;  %1876 = vmatpush1.bf16.msra.mxu1 %v4448_v21  ;;  %v4500_v19 = vld [vmem:[#allocation5 + $0x4a0] ss:$36 sps:$4 sm:$0xff]   ;;  %v4835_v21 = vmov 0.0  }
  0xf2   : > { %1791 = vmatprep.subr.bf16.mxu0 %v4387_v20  ;;  %1877 = vmatprep.subr.bf16.mxu1 %v4456_v22  ;;  %v4502_v20 = vld [vmem:[#allocation5 + $0x2a8] ss:$36 sps:$4 sm:$0xff]  }
  0xf3   : > { %v4504_v22 = vld [vmem:[#allocation5 + $0x68] ss:$36 sps:$4 sm:$0xff]  }
  0xf5   : > { %1792 = vmatpush1.bf16.msra.mxu0 %v4385_v23  ;;  %1878 = vmatpush1.bf16.msra.mxu1 %v4454_v25  ;;  %v4503_v23 = vld [vmem:[#allocation5 + $0x4e8] ss:$36 sps:$4 sm:$0xff]   ;;  %v4507_v25 = vld [vmem:[#allocation5 + $0xb0] ss:$36 sps:$4 sm:$0xff]  }
  0xf6   : > { %1793 = vmatprep.subr.bf16.mxu0 %v4390_v24  ;;  %1879 = vmatprep.subr.bf16.mxu1 %v4462_v26  ;;  %v4505_v24 = vld [vmem:[#allocation5 + $0x2f0] ss:$36 sps:$4 sm:$0xff]  }
  0xf7   : > { %v4506_v26 = vld [vmem:[#allocation5 + $0x530] ss:$36 sps:$4 sm:$0xff]  }
  0xf9   : > { %1794 = vmatpush1.bf16.msra.mxu0 %v4388_v27  ;;  %1880 = vmatpush1.bf16.msra.mxu1 %v4460_v29  ;;  %v4508_v27 = vld [vmem:[#allocation5 + $0x338] ss:$36 sps:$4 sm:$0xff]  }
  0xfa   : > { %1795 = vmatprep.subr.bf16.mxu0 %v4393_v28  ;;  %1881 = vmatprep.subr.bf16.mxu1 %v4465_v30  ;;  %v4510_v28 = vld [vmem:[#allocation5 + $0xf8] ss:$36 sps:$4 sm:$0xff]   ;;  %v4511_v30 = vld [vmem:[#allocation5 + $0x380] ss:$36 sps:$4 sm:$0xff]  }
  0xfb   : > { %v4509_v29 = vld [vmem:[#allocation5 + $0x578] ss:$36 sps:$4 sm:$0xff]  }
  0xfd   : > { %1796 = vmatpush1.bf16.msra.mxu0 %v4391_v31  ;;  %1882 = vmatpush1.bf16.msra.mxu1 %v4463_v33  ;;  %v4512_v31 = vld [vmem:[#allocation5 + $0x5c0] ss:$36 sps:$4 sm:$0xff]   ;;  %v4516_v33 = vld [vmem:[#allocation5 + $0x188] ss:$36 sps:$4 sm:$0xff]  }
  0xfe   : > { %1797 = vmatprep.subr.bf16.mxu0 %v4399_v32  ;;  %1883 = vmatprep.subr.bf16.mxu1 %v4468_v34  ;;  %v4514_v32 = vld [vmem:[#allocation5 + $0x3c8] ss:$36 sps:$4 sm:$0xff]  }
  0xff   : > { %v4515_v34 = vld [vmem:[#allocation5 + $0x608] ss:$36 sps:$4 sm:$0xff]  }
 0x101   : > { %1798 = vmatpush1.bf16.msra.mxu0 %v4397_v35  ;;  %1884 = vmatpush1.bf16.msra.mxu1 %v4466_v37  ;;  %v4517_v35 = vld [vmem:[#allocation5 + $0x410] ss:$36 sps:$4 sm:$0xff]  }
 0x102   : > { %1799 = vmatprep.subr.bf16.mxu0 %v4405_v36  ;;  %1885 = vmatprep.subr.bf16.mxu1 %v4471_v38  ;;  %v4519_v36 = vld [vmem:[#allocation5 + $0x1d0] ss:$36 sps:$4 sm:$0xff]   ;;  %v4520_v38 = vld [vmem:[#allocation5 + $0x458] ss:$36 sps:$4 sm:$0xff]  }
 0x103   : > { %v4518_v37 = vld [vmem:[#allocation5 + $0x650] ss:$36 sps:$4 sm:$0xff]  }
 0x105   : > { %1800 = vmatpush1.bf16.msra.mxu0 %v4403_v39  ;;  %1886 = vmatpush1.bf16.msra.mxu1 %v4469_v41  ;;  %v4522_v39 = vld [vmem:[#allocation5 + $0x218] ss:$36 sps:$4 sm:$0xff]  }
 0x106   : > { %1801 = vmatprep.subr.bf16.mxu0 %v4411_v40  ;;  %1887 = vmatprep.subr.bf16.mxu1 %v4474_v42  ;;  %v4521_v40 = vld [vmem:[#allocation5 + $0x698] ss:$36 sps:$4 sm:$0xff]  }
 0x109   : > { %1802 = vmatpush1.bf16.msra.mxu0 %v4409_v44  ;;  %1888 = vmatpush1.bf16.msra.mxu1 %v4472_v45 }
 0x10a   : > { %1814 = vmatprep.subr.bf16.mxu0 %v4417_v46  ;;  %1900 = vmatprep.subr.bf16.mxu1 %v4477_v47 }
 0x10c   : > { %1804 = vmatmul.mubr.bf16.vlgmr.msra.gmra.mrb[4].mxu0 %v5062_v8  ;;  %1890 = vmatmul.mubr.bf16.vlgmr.msra.gmra.mrb[4].mxu1 %v5062_v8 }
 0x10d   : > { %1815 = vmatpush1.bf16.msra.mxu0 %v4415_v48  ;;  %1846 = vmatprep.mubr.bf16.mxu0 %v4834_v16 }
 0x10e   : > { %1816 = vmatprep.subr.bf16.mxu0 %v4423_v49  ;;  %1901 = vmatpush1.bf16.msra.mxu1 %v4475_v51 }
 0x10f   : > { %1902 = vmatprep.subr.bf16.mxu1 %v4480_v52  ;;  %1932 = vmatprep.mubr.bf16.mxu1 %v4834_v16 }
 0x111   : > { %1817 = vmatpush1.bf16.msra.mxu0 %v4421_v53 }
 0x112   : > { %1818 = vmatprep.subr.bf16.mxu0 %v4429_v54  ;;  %1903 = vmatpush1.bf16.msra.mxu1 %v4478_v55 }
 0x113   : > { %1904 = vmatprep.subr.bf16.mxu1 %v4483_v56 }
 0x115   : > { %1819 = vmatpush1.bf16.msra.mxu0 %v4427_v57 }
 0x116   : > { %1820 = vmatprep.subr.bf16.mxu0 %v4435_v58  ;;  %1905 = vmatpush1.bf16.msra.mxu1 %v4481_v59 }
 0x117   : > { %1906 = vmatprep.subr.bf16.mxu1 %v4486_v60 }
 0x119   : > { %1821 = vmatpush1.bf16.msra.mxu0 %v4433_v61 }
 0x11a   : > { %1822 = vmatprep.subr.bf16.mxu0 %v4441_v62  ;;  %1907 = vmatpush1.bf16.msra.mxu1 %v4484_v63 }
 0x11b   : > { %1908 = vmatprep.subr.bf16.mxu1 %v4489_v0 }
 0x11d   : > { %1823 = vmatpush1.bf16.msra.mxu0 %v4439_v1 }
 0x11e   : > { %1824 = vmatprep.subr.bf16.mxu0 %v4447_v2  ;;  %1909 = vmatpush1.bf16.msra.mxu1 %v4487_v3 }
 0x11f   : > { %1910 = vmatprep.subr.bf16.mxu1 %v4492_v4 }
 0x121   : > { %1825 = vmatpush1.bf16.msra.mxu0 %v4445_v5 }
 0x122   : > { %1826 = vmatprep.subr.bf16.mxu0 %v4453_v6  ;;  %1911 = vmatpush1.bf16.msra.mxu1 %v4490_v7 }
 0x123   : > { %1912 = vmatprep.subr.bf16.mxu1 %v4495_v9 }
 0x125   : > { %1827 = vmatpush1.bf16.msra.mxu0 %v4451_v10 }
 0x126   : > { %1828 = vmatprep.subr.bf16.mxu0 %v4459_v11  ;;  %1913 = vmatpush1.bf16.msra.mxu1 %v4493_v12 }
 0x127   : > { %1914 = vmatprep.subr.bf16.mxu1 %v4498_v13 }
 0x129   : > { %1829 = vmatpush1.bf16.msra.mxu0 %v4457_v14 }
 0x12a   : > { %1915 = vmatpush1.bf16.msra.mxu1 %v4496_v15  ;;  %3891 = vmatprep.subr.bf16.mxu0 %v4499_v17 }
 0x12b   : > { %3977 = vmatprep.subr.bf16.mxu1 %v4835_v21 }
 0x12c   : > { %1847 = vmatmul.mubr.bf16.vlgmr.msra.gmra.mrb[4].mxu0 %v5070_v43 }
 0x12d   : > { %1933 = vmatmul.mubr.bf16.vlgmr.msra.gmra.mrb[4].mxu1 %v5070_v43  ;;  %3892 = vmatpush3.bf16.msra.mxu0 %v4501_v18  ;;  %v2034_v18 = vlaneseq }
 0x12e   : > { %3978 = vmatpush3.bf16.msra.mxu1 %v4500_v19  ;;  %3893 = vmatprep.subr.bf16.mxu0 %v4502_v20 }
 0x12f   : > { %3979 = vmatprep.subr.bf16.mxu1 %v4835_v21  ;;  %1975 = vmatprep.mubr.bf16.mxu0 %v5056_v50  ;;  %v4513_v50 = vld [vmem:[#allocation5 + $0x140] ss:$36 sps:$4 sm:$0xff]   ;;  %v5130_v19 = vshrl.u32 %v2034_v18, 7  ;;  %v2038_v20 = vand.u32 127, %v2034_v18 }
 0x130   : > { %3993 = vmatprep.mubr.msk.bf16.mxu1 %vm4836_vm0, %v4835_v21 }
 0x131   : > { %3894 = vmatpush3.bf16.msra.mxu0 %v4504_v22  ;;  %v2036_v22 = vadd.s32 8, %v5130_v19  ;;  %vm5134_vm2 = vcmp.le.s32.totalorder %v2038_v20, %v5130_v19 }
 0x132   : > { %3980 = vmatpush3.bf16.msra.mxu1 %v4503_v23  ;;  %3895 = vmatprep.subr.bf16.mxu0 %v4505_v24 }
 0x133   : > { %3981 = vmatprep.subr.bf16.mxu1 %v4835_v21  ;;  %vm5138_vm4 = vcmp.le.s32.totalorder %v2038_v20, %v2036_v22 }
 0x135   : > { %3896 = vmatpush3.bf16.msra.mxu0 %v4507_v25 }
 0x136   : > { %3982 = vmatpush3.bf16.msra.mxu1 %v4506_v26  ;;  %3897 = vmatprep.subr.bf16.mxu0 %v4508_v27 }
 0x137   : > { %3983 = vmatprep.subr.bf16.mxu1 %v4835_v21 }
 0x139   : > { %3898 = vmatpush3.bf16.msra.mxu0 %v4510_v28 }
 0x13a   : > { %3984 = vmatpush3.bf16.msra.mxu1 %v4509_v29  ;;  %3899 = vmatprep.subr.bf16.mxu0 %v4511_v30 }
 0x13b   : > { %3985 = vmatprep.subr.bf16.mxu1 %v4835_v21 }
 0x13d   : > { %3900 = vmatpush3.bf16.msra.mxu0 %v4513_v50 }
 0x13e   : > { %3986 = vmatpush3.bf16.msra.mxu1 %v4512_v31  ;;  %3901 = vmatprep.subr.bf16.mxu0 %v4514_v32 }
 0x13f   : > { %3987 = vmatprep.subr.bf16.mxu1 %v4835_v21 }
 0x141   : > { %3902 = vmatpush3.bf16.msra.mxu0 %v4516_v33 }
 0x142   : > { %3988 = vmatpush3.bf16.msra.mxu1 %v4515_v34  ;;  %3903 = vmatprep.subr.bf16.mxu0 %v4517_v35 }
 0x143   : > { %3989 = vmatprep.subr.bf16.mxu1 %v4835_v21 }
 0x145   : > { %3904 = vmatpush3.bf16.msra.mxu0 %v4519_v36 }
 0x146   : > { %3990 = vmatpush3.bf16.msra.mxu1 %v4518_v37  ;;  %3905 = vmatprep.subr.bf16.mxu0 %v4520_v38 }
 0x147   : > { %3991 = vmatprep.subr.bf16.mxu1 %v4835_v21 }
 0x149   : > { %3906 = vmatpush3.bf16.msra.mxu0 %v4522_v39 }
 0x14a   : > { %3992 = vmatpush3.bf16.msra.mxu1 %v4521_v40  ;;  %4021 = vmatprep.subr.bf16.mxu0 %v4835_v21 }
 0x14b   : > { %3997 = vmatprep.subr.bf16.mxu1 %v4835_v21 }
 0x14c   : > { %1976 = vmatmul.mubr.bf16.vlgmr.msra.gmra.mrb[8].mxu0 %v5062_v8 }
 0x14d   : > { %3994 = vmatmul.mubr.bf16.vlgmr.msra.gmra.mrb[8].mxu1 %v5070_v43  ;;  %4023 = vmatprep.mubr.msk.bf16.mxu0 %vm4836_vm0, %v4835_v21 }
 0x14e   : > { %3999 = vmatprep.mubr.msk.bf16.mxu1 %vm4836_vm0, %v4835_v21 }
 0x19f   : > { %v1676_v41 = vpop.f32.mrb[0].mxu0  ;;  %v1762_v42 = vpop.f32.mrb[0].mxu1 }
 0x1a0   : > { %v1678_v44 = vpop.f32.mrb[1].mxu0  ;;  %v1764_v45 = vpop.f32.mrb[1].mxu1 }
 0x1a1   : > { %v1680_v46 = vpop.f32.mrb[2].mxu0  ;;  %v1766_v47 = vpop.f32.mrb[2].mxu1 }
 0x1a2   : > { %v2025_v48 = vpack.c.bf16 %v1680_v46, %v1676_v41  ;;  %v5101_v49 = vpack.c.bf16 %v1766_v47, %v1762_v42  ;;  %v1682_v51 = vpop.f32.mrb[3].mxu0  ;;  %v1768_v52 = vpop.f32.mrb[3].mxu1 }
 0x1a3   : > { %v2026_v8 = vpack.c.bf16 %v1682_v51, %v1678_v44  ;;  %v2028_v43 = vpack.c.bf16 %v1768_v52, %v1764_v45 }
 0x1a5   : > { %v2046_v53 = vsel %vm2041_vm1, %v2028_v43, 0  ;;  %2163 = vrot.lane.b32.xlu1 %v2028_v43, %s4837_s21 }
 0x1a6   : > { %3998 = vmatpush3.bf16.xpose.msra.mxu1 %v2046_v53 }
 0x1a7   : > { %4003 = vmatprep.subr.bf16.mxu1 %v4835_v21 }
 0x1a9   : > { %2160 = vrot.lane.b32.xlu1 %v2025_v48, %s4837_s21 }
 0x1ad   : > { %4000 = vmatmul.mubr.msk.bf16.vlgmr.msra.gmra.mrb[12].mxu1 %vm2041_vm1, %v2025_v48  ;;  %2402 = vrot.lane.b32.xlu1 %v2026_v8, %s4837_s21 }
 0x1ae   : > { %4005 = vmatprep.mubr.msk.bf16.mxu1 %vm4836_vm0, %v4835_v21 }
 0x1ff   : > { %v1848_v54 = vpop.f32.mrb[4].mxu0 }
 0x200   : > { %v1850_v55 = vpop.f32.mrb[5].mxu0  ;;  %v1934_v56 = vpop.f32.mrb[4].mxu1 }
 0x201   : > { %v1852_v57 = vpop.f32.mrb[6].mxu0  ;;  %v1936_v58 = vpop.f32.mrb[5].mxu1 }
 0x202   : > { %v2029_v59 = vpack.c.bf16 %v1852_v57, %v1848_v54  ;;  %v1854_v60 = vpop.f32.mrb[7].mxu0  ;;  %v1938_v61 = vpop.f32.mrb[6].mxu1 }
 0x203   : > { %v5111_v62 = vpack.c.bf16 %v1854_v60, %v1850_v55  ;;  %v5113_v63 = vpack.c.bf16 %v1938_v61, %v1934_v56  ;;  %v1940_v0 = vpop.f32.mrb[7].mxu1 }
 0x204   : > { %v2289_v1 = vsel %vm2041_vm1, %v2029_v59, 0  ;;  %v5116_v2 = vpack.c.bf16 %v1940_v0, %v1936_v58 }
 0x205   : > { %4022 = vmatpush3.bf16.xpose.msra.mxu0 %v2289_v1  ;;  %2647 = vrot.lane.b32.xlu1 %v5111_v62, %s4837_s21  ;;  %v2531_v43 = vsel %vm2041_vm1, %v5111_v62, 0 }
 0x206   : > { %4004 = vmatpush3.bf16.msra.mxu1 %v5113_v63  ;;  %4033 = vmatprep.subr.bf16.mxu0 %v4835_v21 }
 0x207   : > { %4009 = vmatprep.subr.bf16.mxu1 %v4835_v21 }
 0x209   : > { %2644 = vrot.lane.b32.xlu1 %v5101_v49, %s4837_s21 }
 0x20c   : > { %4024 = vmatmul.mubr.msk.bf16.vlgmr.msra.gmra.mrb[12].mxu0 %vm2041_vm1, %v2026_v8 }
 0x20d   : > { %4035 = vmatprep.mubr.msk.bf16.mxu0 %vm4836_vm0, %v4835_v21 }
 0x217   : > { %v2164_v42 = vpop.permute.xlu1 %2163 }
 0x218   : > { %v2169_v56 = vsel %vm2041_vm1, %v2164_v42, 0 }
 0x21b   : > { %v2161_v52 = vpop.permute.xlu1 %2160 }
 0x21f   : > { %v3907_v3 = vpop.f32.mrb[8].mxu0  ;;  %v2403_v8 = vpop.permute.xlu1 %2402 }
 0x220   : > { %v3908_v4 = vpop.f32.mrb[9].mxu0  ;;  %v2018_v5 = vpop.f32.mrb[8].mxu1 }
 0x221   : > { %v3909_v6 = vadd.f32 %v3908_v4, %v3907_v3  ;;  %v3910_v7 = vpop.f32.mrb[10].mxu0  ;;  %v3995_v9 = vpop.f32.mrb[9].mxu1 }
 0x222   : > { %v3911_v10 = vpop.f32.mrb[11].mxu0  ;;  %v2021_v11 = vpop.f32.mrb[10].mxu1 }
 0x223   : > { %v2019_v12 = vadd.f32 %v3909_v6, %v2018_v5  ;;  %v3912_v13 = vadd.f32 %v3911_v10, %v3910_v7  ;;  %v3996_v14 = vpop.f32.mrb[11].mxu1 }
 0x225   : > { %v2022_v15 = vadd.f32 %v3912_v13, %v2021_v11 }
 0x227   : > { %v5128_v17 = vpack.c.bf16 %v2022_v15, %v2019_v12 }
 0x277   : > { %v2648_v57 = vpop.permute.xlu1 %2647 }
 0x278   : > { %v2653_v58 = vsel %vm2041_vm1, %v2648_v57, 0 }
 0x280   : > { %v2082_v24 = vpop.f32.mrb[12].mxu1 }
 0x281   : > { %v2089_v26 = vsel %vm5134_vm2, %v2082_v24, -1e+30  ;;  %v4001_v27 = vpop.f32.mrb[13].mxu1 }
 0x282   : > { %v2085_v28 = vpop.f32.mrb[14].mxu1  ;;  %v2092_v29 = vsel %vm2091_vm3, %v2089_v26, -inf }
 0x283   : > { %v2090_v30 = vsel %vm5138_vm4, %v2085_v28, -1e+30  ;;  %2093 = vmax.xlane.f32.xlu0 %v2092_v29  ;;  %v4002_v50 = vpop.f32.mrb[15].mxu1 }
 0x284   : > { %v2095_v31 = vsel %vm2091_vm3, %v2090_v30, -inf }
 0x287   : > { %2096 = vmax.xlane.f32.xlu0 %v2095_v31 }
 0x29d   : > { %2405 = vrot.lane.b32.xlu0 %v2029_v59, %s4837_s21  ;;  %v2645_v59 = vpop.permute.xlu1 %2644 }
 0x2df   : > { %v2325_v32 = vpop.f32.mrb[12].mxu0 }
 0x2e0   : > { %v5151_v33 = vsel %vm5134_vm2, %v2325_v32, -1e+30  ;;  %v4025_v34 = vpop.f32.mrb[13].mxu0 }
 0x2e1   : > { %v2328_v35 = vpop.f32.mrb[14].mxu0  ;;  %v2334_v36 = vsel %vm2091_vm3, %v5151_v33, -inf }
 0x2e2   : > { %v5157_v37 = vsel %vm5138_vm4, %v2328_v35, -1e+30  ;;  %2335 = vmax.xlane.f32.xlu1 %v2334_v36  ;;  %v4026_v38 = vpop.f32.mrb[15].mxu0 }
 0x2e3   : > { %v2337_v39 = vsel %vm2091_vm3, %v5157_v37, -inf }
 0x2e6   : > { %2338 = vmax.xlane.f32.xlu1 %v2337_v39 }
 0x310   : > { %v2094_v40 = vpop.xlane.xlu0 %2093 }
 0x311   : > { %v2098_v41 = vsub.f32 %v2089_v26, %v2094_v40 }
 0x313   : > { %v2100_v44 = vmul.f32 1.442695, %v2098_v41 }
 0x314   : > { %v2097_v45 = vpop.xlane.xlu0 %2096 }
 0x315   : > { %v2099_v46 = vsub.f32 %v2090_v30, %v2097_v45  ;;  %4619 = vpow2.f32 %v2100_v44 }
 0x317   : > { %v2102_v47 = vmul.f32 1.442695, %v2099_v46 }
 0x318   : > { %v2406_v48 = vpop.permute.xlu0 %2405 }
 0x319   : > { %4621 = vpow2.f32 %v2102_v47  ;;  %v2411_v51 = vsel %vm2041_vm1, %v2406_v48, 0 }
 0x31a   : > { %4034 = vmatpush3.bf16.xpose.msra.mxu0 %v2411_v51 }
 0x31b   : > { %4045 = vmatprep.subr.bf16.mxu0 %v4835_v21 }
 0x31f   : > { %v5166_v53 = vpop.eup %4619 }
 0x321   : > { %4036 = vmatmul.mubr.msk.bf16.vlgmr.msra.gmra.mrb[16].mxu0 %vm2041_vm1, %v2403_v8 }
 0x322   : > { %4046 = vmatpush3.bf16.xpose.msra.mxu0 %v2531_v43  ;;  %4047 = vmatprep.mubr.msk.bf16.mxu0 %vm4836_vm0, %v4835_v21 }
 0x323   : > { %v5170_v54 = vpop.eup %4621  ;;  %4057 = vmatprep.subr.bf16.mxu0 %v4835_v21 }
 0x324   : > { %v2110_v55 = vpack.c.bf16 %v5170_v54, %v5166_v53 }
 0x326   : > { %4006 = vmatmul.mubr.msk.bf16.vlgmr.msra.gmra.mrb[16].mxu1 %vm2091_vm3, %v2110_v55 }
 0x327   : > { %4010 = vmatpush3.bf16.xpose.msra.mxu1 %v2169_v56  ;;  %4011 = vmatprep.mubr.msk.bf16.mxu1 %vm4836_vm0, %v4835_v21 }
 0x328   : > { %4015 = vmatprep.subr.bf16.mxu1 %v4835_v21 }
 0x329   : > { %4048 = vmatmul.mubr.msk.bf16.vlgmr.msra.gmra.mrb[20].mxu0 %vm2041_vm1, %v5101_v49 }
 0x32a   : > { %4058 = vmatpush3.bf16.xpose.msra.mxu0 %v2653_v58  ;;  %4059 = vmatprep.mubr.msk.bf16.mxu0 %vm4836_vm0, %v4835_v21 }
 0x32e   : > { %4012 = vmatmul.mubr.msk.bf16.vlgmr.msra.gmra.mrb[20].mxu1 %vm2041_vm1, %v2161_v52 }
 0x32f   : > { %4017 = vmatprep.mubr.msk.bf16.mxu1 %vm4836_vm0, %v4835_v21 }
 0x331   : > { %4060 = vmatmul.mubr.msk.bf16.vlgmr.msra.gmra.mrb[24].mxu0 %vm2041_vm1, %v2645_v59 }
 0x3f4   : > { %v2447_v60 = vpop.f32.mrb[16].mxu0 }
 0x3f5   : > { %v2454_v61 = vsel %vm5134_vm2, %v2447_v60, -1e+30  ;;  %v4037_v62 = vpop.f32.mrb[17].mxu0 }
 0x3f6   : > { %v2450_v0 = vpop.f32.mrb[18].mxu0  ;;  %v2456_v49 = vsel %vm2091_vm3, %v2454_v61, -inf }
 0x3f7   : > { %v2455_v1 = vsel %vm5138_vm4, %v2450_v0, -1e+30  ;;  %2457 = vmax.xlane.f32.xlu0 %v2456_v49  ;;  %v4038_v3 = vpop.f32.mrb[19].mxu0 }
 0x3f8   : > { %v2459_v4 = vsel %vm2091_vm3, %v2455_v1, -inf }
 0x3f9   : > { %v5195_v5 = vpop.f32.mrb[16].mxu1  ;;  %2460 = vmax.xlane.f32.xlu1 %v2459_v4 }
 0x3fa   : > { %v4007_v6 = vpop.f32.mrb[17].mxu1 }
 0x3fb   : > { %v5197_v7 = vpop.f32.mrb[18].mxu1 }
 0x3fc   : > { %v4008_v9 = vpop.f32.mrb[19].mxu1  ;;  %v2567_v10 = vpop.f32.mrb[20].mxu0 }
 0x3fd   : > { %v4049_v11 = vpop.f32.mrb[21].mxu0  ;;  %v5204_v24 = vsel %vm5134_vm2, %v2567_v10, -1e+30 }
 0x3fe   : > { %v2570_v12 = vpop.f32.mrb[22].mxu0  ;;  %v2576_v32 = vsel %vm2091_vm3, %v5204_v24, -inf }
 0x3ff   : > { %v4050_v13 = vpop.f32.mrb[23].mxu0  ;;  %v5213_v34 = vsel %vm5138_vm4, %v2570_v12, -1e+30 }
 0x400   : > { %v2579_v35 = vsel %vm2091_vm3, %v5213_v34, -inf }
 0x401   : > { %v2205_v14 = vpop.f32.mrb[20].mxu1 }
 0x402   : > { %v2212_v15 = vsel %vm5134_vm2, %v2205_v14, -1e+30  ;;  %v4013_v18 = vpop.f32.mrb[21].mxu1 }
 0x403   : > { %v2208_v20 = vpop.f32.mrb[22].mxu1  ;;  %v2214_v22 = vsel %vm2091_vm3, %v2212_v15, -inf }
 0x404   : > { %v2213_v26 = vsel %vm5138_vm4, %v2208_v20, -1e+30  ;;  %v4014_v27 = vpop.f32.mrb[23].mxu1  ;;  %2215 = vmax.xlane.f32.xlu1 %v2214_v22  ;;  %v2689_v28 = vpop.f32.mrb[24].mxu0 }
 0x405   : > { %v4061_v29 = vpop.f32.mrb[25].mxu0  ;;  %v2217_v30 = vsel %vm2091_vm3, %v2213_v26, -inf  ;;  %v5223_v36 = vsel %vm5134_vm2, %v2689_v28, -1e+30 }
 0x406   : > { %2218 = vmax.xlane.f32.xlu0 %v2217_v30  ;;  %v2692_v50 = vpop.f32.mrb[26].mxu0  ;;  %v2698_v38 = vsel %vm2091_vm3, %v5223_v36, -inf }
 0x407   : > { %v4062_v31 = vpop.f32.mrb[27].mxu0  ;;  %v5229_v39 = vsel %vm5138_vm4, %v2692_v50, -1e+30 }
 0x408   : > { %2577 = vmax.xlane.f32.xlu1 %v2576_v32  ;;  %v2701_v40 = vsel %vm2091_vm3, %v5229_v39, -inf }
 0x40c   : > { %2580 = vmax.xlane.f32.xlu1 %v2579_v35 }
 0x41c   : > { %2234 = vrot.lane.b32.xlu0 %v5113_v63, %s4837_s21  ;;  %v2336_v63 = vpop.xlane.xlu1 %2335 }
 0x41d   : > { %2476 = vrot.lane.b32.xlu1 %v5116_v2, %s4837_s21  ;;  %v2340_v60 = vsub.f32 %v5151_v33, %v2336_v63  ;;  %v2107_v63 = vsel %vm2091_vm3, %v5170_v54, 0.0  ;;  %v4560_v54 = vld [vmem:[#allocation7 + $0xf8] ss:$12 sps:$4 sm:$0xff]  }
 0x41f   : > { %v2342_v0 = vmul.f32 1.442695, %v2340_v60  ;;  %v4544_v60 = vld [vmem:[#allocation7 + $0xa8] ss:$12 sps:$4 sm:$0xff]  }
 0x420   : > { %v2339_v41 = vpop.xlane.xlu1 %2338 }
 0x421   : > { %v2341_v57 = vsub.f32 %v5157_v37, %v2339_v41  ;;  %v4523_v41 = vld [vmem:[#allocation7] ss:$12 sps:$4 sm:$0xff]  }
 0x423   : > { %v2344_v62 = vmul.f32 1.442695, %v2341_v57  ;;  %v4543_v57 = vld [vmem:[#allocation7 + $0x94] ss:$12 sps:$4 sm:$0xff]  }
 0x43b   : > { %2699 = vmax.xlane.f32.xlu0 %v2698_v38 }
 0x441   : > { %2702 = vmax.xlane.f32.xlu1 %v2701_v40 }
 0x451   : > { %2718 = vrot.lane.b32.xlu0 %v5128_v17, %s4837_s21 }
 0x484   : > { %v2458_v23 = vpop.xlane.xlu0 %2457 }
 0x485   : > { %v2462_v42 = vsub.f32 %v2454_v61, %v2458_v23  ;;  %v4525_v23 = vld [vmem:[#allocation7 + $0x4] ss:$12 sps:$4 sm:$0xff]  }
 0x486   : > { %v2461_v44 = vpop.xlane.xlu1 %2460  ;;  %3299 = vmatprep.subr.bf16.mxu0 %v4525_v23 }
 0x487   : > { %v2464_v45 = vmul.f32 1.442695, %v2462_v42  ;;  %v2463_v46 = vsub.f32 %v2455_v1, %v2461_v44  ;;  %v4528_v42 = vld [vmem:[#allocation7 + $0x1c] ss:$12 sps:$4 sm:$0xff]   ;;  %3300 = vmatpush1.bf16.msra.mxu0 %v4523_v41  ;;  %v4526_v44 = vld [vmem:[#allocation7 + $0x18] ss:$12 sps:$4 sm:$0xff]  }
 0x488   : > { %3301 = vmatprep.subr.bf16.mxu0 %v4528_v42  ;;  %v4581_v41 = vld [vmem:[#allocation7 + $0x98] ss:$12 sps:$4 sm:$0xff]  }
 0x489   : > { %4623 = vpow2.f32 %v2464_v45  ;;  %v2466_v47 = vmul.f32 1.442695, %v2463_v46  ;;  %v4531_v45 = vld [vmem:[#allocation7 + $0x34] ss:$12 sps:$4 sm:$0xff]  }
 0x48a   : > { %v4550_v46 = vld [vmem:[#allocation7 + $0xc8] ss:$12 sps:$4 sm:$0xff]  }
 0x48b   : > { %4625 = vpow2.f32 %v2466_v47  ;;  %v4551_v47 = vld [vmem:[#allocation7 + $0x8] ss:$12 sps:$4 sm:$0xff]   ;;  %3302 = vmatpush1.bf16.msra.mxu0 %v4526_v44 }
 0x48c   : > { %3303 = vmatprep.subr.bf16.mxu0 %v4531_v45  ;;  %v4582_v44 = vld [vmem:[#allocation7 + $0x168] ss:$12 sps:$4 sm:$0xff]   ;;  %v4584_v45 = vld [vmem:[#allocation7 + $0x16c] ss:$12 sps:$4 sm:$0xff]  }
 0x491   : > { %v2216_v25 = vpop.xlane.xlu1 %2215 }
 0x492   : > { %v2220_v48 = vsub.f32 %v2212_v15, %v2216_v25  ;;  %v4529_v25 = vld [vmem:[#allocation7 + $0x30] ss:$12 sps:$4 sm:$0xff]  }
 0x493   : > { %v4624_v51 = vpop.eup %4623  ;;  %v2219_v52 = vpop.xlane.xlu0 %2218  ;;  %3304 = vmatpush1.bf16.msra.mxu0 %v4529_v25  ;;  %v4586_v25 = vld [vmem:[#allocation7 + $0xb0] ss:$12 sps:$4 sm:$0xff]  }
 0x494   : > { %v2222_v8 = vmul.f32 1.442695, %v2220_v48  ;;  %v2221_v43 = vsub.f32 %v2213_v26, %v2219_v52  ;;  %v2468_v55 = vsel %vm2091_vm3, %v4624_v51, 0.0  ;;  %v4555_v48 = vld [vmem:[#allocation7 + $0xe0] ss:$12 sps:$4 sm:$0xff]  }
 0x495   : > { %v4626_v56 = vpop.eup %4625  ;;  %2469 = vadd.xlane.f32.xlu1 %v2468_v55  ;;  %v2578_v49 = vpop.xlane.xlu1 %2577  ;;  %v4532_v52 = vld [vmem:[#allocation7 + $0x48] ss:$12 sps:$4 sm:$0xff]  }
 0x496   : > { %4627 = vpow2.f32 %v2222_v8  ;;  %v2224_v58 = vmul.f32 1.442695, %v2221_v43  ;;  %v2471_v61 = vsel %vm2091_vm3, %v4626_v56, 0.0  ;;  %v2582_v11 = vsub.f32 %v5204_v24, %v2578_v49  ;;  %v4537_v8 = vld [vmem:[#allocation7 + $0x64] ss:$12 sps:$4 sm:$0xff]  }
 0x497   : > { %v2235_v59 = vpop.permute.xlu0 %2234  ;;  %v4535_v43 = vld [vmem:[#allocation7 + $0x60] ss:$12 sps:$4 sm:$0xff]   ;;  %v4540_v55 = vld [vmem:[#allocation7 + $0x7c] ss:$12 sps:$4 sm:$0xff]  }
 0x498   : > { %4629 = vpow2.f32 %v2224_v58  ;;  %4016 = vmatpush3.bf16.msra.mxu1 %v2235_v59  ;;  %v2584_v15 = vmul.f32 1.442695, %v2582_v11  ;;  %v4541_v58 = vld [vmem:[#allocation7 + $0x90] ss:$12 sps:$4 sm:$0xff]   ;;  %v4546_v59 = vld [vmem:[#allocation7 + $0xac] ss:$12 sps:$4 sm:$0xff]  }
 0x499   : > { %2472 = vadd.xlane.f32.xlu1 %v2471_v61  ;;  %4027 = vmatprep.subr.bf16.mxu1 %v4835_v21  ;;  %4631 = vpow2.f32 %v2344_v62  ;;  %v2581_v4 = vpop.xlane.xlu1 %2580  ;;  %v4549_v61 = vld [vmem:[#allocation7 + $0xc4] ss:$12 sps:$4 sm:$0xff]   ;;  %v4554_v49 = vld [vmem:[#allocation7 + $0xdc] ss:$12 sps:$4 sm:$0xff]  }
 0x49a   : > { %4633 = vpow2.f32 %v2342_v0  ;;  %v2583_v9 = vsub.f32 %v5213_v34, %v2581_v4  ;;  %v4547_v0 = vld [vmem:[#allocation7 + $0xc0] ss:$12 sps:$4 sm:$0xff]   ;;  %v4557_v4 = vld [vmem:[#allocation7 + $0xf0] ss:$12 sps:$4 sm:$0xff]  }
 0x49b   : > { %v4565_v11 = vld [vmem:[#allocation7 + $0x110] ss:$12 sps:$4 sm:$0xff]  }
 0x49c   : > { %v2586_v13 = vmul.f32 1.442695, %v2583_v9  ;;  %v4561_v9 = vld [vmem:[#allocation7 + $0x38] ss:$12 sps:$4 sm:$0xff]  }
 0x49d   : > { %v2477_v18 = vpop.permute.xlu1 %2476 }
 0x49e   : > { %4635 = vpow2.f32 %v2586_v13  ;;  %v4566_v13 = vld [vmem:[#allocation7 + $0x50] ss:$12 sps:$4 sm:$0xff]  }
 0x49f   : > { %4637 = vpow2.f32 %v2584_v15  ;;  %v4570_v15 = vld [vmem:[#allocation7 + $0x128] ss:$12 sps:$4 sm:$0xff]  }
 0x4a0   : > { %v4628_v1 = vpop.eup %4627 }
 0x4a1   : > { %v2226_v37 = vsel %vm2091_vm3, %v4628_v1, 0.0 }
 0x4a2   : > { %v4630_v3 = vpop.eup %4629  ;;  %2227 = vadd.xlane.f32.xlu1 %v2226_v37 }
 0x4a3   : > { %v2229_v33 = vsel %vm2091_vm3, %v4630_v3, 0.0  ;;  %v2232_v6 = vpack.c.bf16 %v4630_v3, %v4628_v1  ;;  %v4632_v10 = vpop.eup %4631  ;;  %v4552_v1 = vld [vmem:[#allocation7 + $0xd8] ss:$12 sps:$4 sm:$0xff]   ;;  %v4559_v3 = vld [vmem:[#allocation7 + $0xf4] ss:$12 sps:$4 sm:$0xff]  }
 0x4a4   : > { %2230 = vadd.xlane.f32.xlu0 %v2229_v33  ;;  %v4634_v12 = vpop.eup %4633  ;;  %v2349_v40 = vsel %vm2091_vm3, %v4632_v10, 0.0 }
 0x4a5   : > { %4018 = vmatmul.mubr.msk.bf16.vlgmr.msra.gmra.mrb[24].mxu1 %vm2091_vm3, %v2232_v6  ;;  %v2352_v14 = vpack.c.bf16 %v4632_v10, %v4634_v12  ;;  %v4564_v10 = vld [vmem:[#allocation7 + $0x10c] ss:$12 sps:$4 sm:$0xff]  }
 0x4a6   : > { %4028 = vmatpush3.bf16.msra.mxu1 %v5116_v2  ;;  %4029 = vmatprep.mubr.msk.bf16.mxu1 %vm4836_vm0, %v4835_v21  ;;  %v2474_v2 = vpack.c.bf16 %v4626_v56, %v4624_v51  ;;  %v4556_v51 = vld [vmem:[#allocation7 + $0x20] ss:$12 sps:$4 sm:$0xff]   ;;  %v4538_v56 = vld [vmem:[#allocation7 + $0x78] ss:$12 sps:$4 sm:$0xff]  }
 0x4a7   : > { %4039 = vmatprep.subr.bf16.mxu1 %v4835_v21 }
 0x4a8   : > { %v5258_v20 = vpop.eup %4635 }
 0x4a9   : > { %v5260_v22 = vpop.eup %4637 }
 0x4aa   : > { %v2594_v24 = vpack.c.bf16 %v5258_v20, %v5260_v22 }
 0x4ad   : > { %4030 = vmatmul.mubr.msk.bf16.vlgmr.msra.gmra.mrb[28].mxu1 %vm2091_vm3, %v2352_v14  ;;  %v4569_v14 = vld [vmem:[#allocation7 + $0x124] ss:$12 sps:$4 sm:$0xff]  }
 0x4ae   : > { %4040 = vmatpush3.bf16.msra.mxu1 %v2477_v18  ;;  %4041 = vmatprep.mubr.msk.bf16.mxu1 %vm4836_vm0, %v4835_v21  ;;  %v4567_v18 = vld [vmem:[#allocation7 + $0x120] ss:$12 sps:$4 sm:$0xff]  }
 0x4af   : > { %4051 = vmatprep.subr.bf16.mxu1 %v4835_v21 }
 0x4b5   : > { %4042 = vmatmul.mubr.msk.bf16.vlgmr.msra.gmra.mrb[32].mxu1 %vm2091_vm3, %v2474_v2  ;;  %v4571_v2 = vld [vmem:[#allocation7 + $0x68] ss:$12 sps:$4 sm:$0xff]  }
 0x4b6   : > { %4052 = vmatpush3.bf16.msra.mxu1 %v5128_v17  ;;  %4053 = vmatprep.mubr.msk.bf16.mxu1 %vm4836_vm0, %v4835_v21 }
 0x4b7   : > { %4063 = vmatprep.subr.bf16.mxu1 %v4835_v21 }
 0x4bd   : > { %4054 = vmatmul.mubr.msk.bf16.vlgmr.msra.gmra.mrb[36].mxu1 %vm2091_vm3, %v2594_v24  ;;  %v4574_v24 = vld [vmem:[#allocation7 + $0x13c] ss:$12 sps:$4 sm:$0xff]  }
 0x4be   : > { %4065 = vmatprep.mubr.msk.bf16.mxu1 %vm4836_vm0, %v4835_v21 }
 0x4c8   : > { %v2700_v26 = vpop.xlane.xlu0 %2699 }
 0x4c9   : > { %v2704_v17 = vsub.f32 %v5223_v36, %v2700_v26  ;;  %v2346_v36 = vsel %vm2091_vm3, %v4634_v12, 0.0  ;;  %v4562_v12 = vld [vmem:[#allocation7 + $0x108] ss:$12 sps:$4 sm:$0xff]   ;;  %v4575_v26 = vld [vmem:[#allocation7 + $0x140] ss:$12 sps:$4 sm:$0xff]  }
 0x4cb   : > { %v2706_v27 = vmul.f32 1.442695, %v2704_v17 }
 0x4cc   : > { %v2719_v28 = vpop.permute.xlu0 %2718 }
 0x4cd   : > { %4639 = vpow2.f32 %v2706_v27  ;;  %4064 = vmatpush3.bf16.msra.mxu1 %v2719_v28 }
 0x4ce   : > { %v2703_v29 = vpop.xlane.xlu1 %2702  ;;  %3946 = vmatprep.subr.bf16.mxu1 %v4550_v46 }
 0x4cf   : > { %v2705_v30 = vsub.f32 %v5229_v39, %v2703_v29  ;;  %v2104_v39 = vsel %vm2091_vm3, %v5166_v53, 0.0  ;;  %v4534_v53 = vld [vmem:[#allocation7 + $0x4c] ss:$12 sps:$4 sm:$0xff]  }
 0x4d0   : > { %3305 = vmatprep.subr.bf16.mxu0 %v4534_v53 }
 0x4d1   : > { %v2708_v50 = vmul.f32 1.442695, %v2705_v30  ;;  %3306 = vmatpush1.bf16.msra.mxu0 %v4532_v52 }
 0x4d2   : > { %3307 = vmatprep.subr.bf16.mxu0 %v4537_v8 }
 0x4d3   : > { %4641 = vpow2.f32 %v2708_v50  ;;  %v4572_v50 = vld [vmem:[#allocation7 + $0x138] ss:$12 sps:$4 sm:$0xff]  }
 0x4d5   : > { %3308 = vmatpush1.bf16.msra.mxu0 %v4535_v43 }
 0x4d6   : > { %3309 = vmatprep.subr.bf16.mxu0 %v4540_v55 }
 0x4d7   : > { %v4640_v31 = vpop.eup %4639 }
 0x4d8   : > { %v2710_v32 = vsel %vm2091_vm3, %v4640_v31, 0.0 }
 0x4d9   : > { %2711 = vadd.xlane.f32.xlu1 %v2710_v32  ;;  %3310 = vmatpush1.bf16.msra.mxu0 %v4538_v56 }
 0x4da   : > { %3311 = vmatprep.subr.bf16.mxu0 %v4543_v57 }
 0x4dd   : > { %v4642_v34 = vpop.eup %4641  ;;  %3312 = vmatpush1.bf16.msra.mxu0 %v4541_v58 }
 0x4de   : > { %v2713_v35 = vsel %vm2091_vm3, %v4642_v34, 0.0  ;;  %v2716_v38 = vpack.c.bf16 %v4642_v34, %v4640_v31  ;;  %3313 = vmatprep.subr.bf16.mxu0 %v4546_v59  ;;  %v4576_v31 = vld [vmem:[#allocation7 + $0x80] ss:$12 sps:$4 sm:$0xff]  }
 0x4df   : > { %2714 = vadd.xlane.f32.xlu1 %v2713_v35 }
 0x4e0   : > { %4066 = vmatmul.mubr.msk.bf16.vlgmr.msra.gmra.mrb[40].mxu1 %vm2091_vm3, %v2716_v38  ;;  %v4579_v38 = vld [vmem:[#allocation7 + $0x154] ss:$12 sps:$4 sm:$0xff]  }
 0x4e1   : > { %3947 = vmatpush3.bf16.msra.mxu1 %v4551_v47  ;;  %3314 = vmatpush1.bf16.msra.mxu0 %v4544_v60  ;;  %v4585_v47 = vld [vmem:[#allocation7 + $0x170] ss:$12 sps:$4 sm:$0xff]  }
 0x4e2   : > { %3948 = vmatprep.subr.bf16.mxu1 %v4555_v48  ;;  %3315 = vmatprep.subr.bf16.mxu0 %v4549_v61  ;;  %v2591_v61 = vsel %vm2091_vm3, %v5258_v20, 0.0 }
 0x4e3   : > { %2347 = vadd.xlane.f32.xlu1 %v2346_v36  ;;  %v4580_v36 = vld [vmem:[#allocation7 + $0x158] ss:$12 sps:$4 sm:$0xff]  }
 0x4e5   : > { %3949 = vmatpush3.bf16.msra.mxu1 %v4556_v51  ;;  %3316 = vmatpush1.bf16.msra.mxu0 %v4547_v0 }
 0x4e6   : > { %3950 = vmatprep.subr.bf16.mxu1 %v4560_v54  ;;  %3317 = vmatprep.subr.bf16.mxu0 %v4554_v49  ;;  %v4589_v49 = vld [vmem:[#allocation7 + $0x184] ss:$12 sps:$4 sm:$0xff]  }
 0x4e7   : > { %2350 = vadd.xlane.f32.xlu1 %v2349_v40 }
 0x4e9   : > { %3318 = vmatpush1.bf16.msra.mxu0 %v4552_v1  ;;  %3951 = vmatpush3.bf16.msra.mxu1 %v4561_v9  ;;  %v2588_v1 = vsel %vm2091_vm3, %v5260_v22, 0.0 }
 0x4ea   : > { %3319 = vmatprep.subr.bf16.mxu0 %v4559_v3  ;;  %3952 = vmatprep.subr.bf16.mxu1 %v4565_v11 }
 0x4eb   : > { %2105 = vadd.xlane.f32.xlu1 %v2104_v39  ;;  %v4577_v39 = vld [vmem:[#allocation7 + $0x150] ss:$12 sps:$4 sm:$0xff]  }
 0x4ed   : > { %3320 = vmatpush1.bf16.msra.mxu0 %v4557_v4  ;;  %3953 = vmatpush3.bf16.msra.mxu1 %v4566_v13 }
 0x4ee   : > { %3321 = vmatprep.subr.bf16.mxu0 %v4564_v10  ;;  %3954 = vmatprep.subr.bf16.mxu1 %v4570_v15 }
 0x4ef   : > { %2108 = vadd.xlane.f32.xlu1 %v2107_v63 }
 0x4f1   : > { %3322 = vmatpush1.bf16.msra.mxu0 %v4562_v12  ;;  %3955 = vmatpush3.bf16.msra.mxu1 %v4571_v2 }
 0x4f2   : > { %3323 = vmatprep.subr.bf16.mxu0 %v4569_v14  ;;  %3956 = vmatprep.subr.bf16.mxu1 %v4575_v26 }
 0x4f5   : > { %3324 = vmatpush1.bf16.msra.mxu0 %v4567_v18  ;;  %3957 = vmatpush3.bf16.msra.mxu1 %v4576_v31 }
 0x4f6   : > { %3325 = vmatprep.subr.bf16.mxu0 %v4574_v24  ;;  %3958 = vmatprep.subr.bf16.mxu1 %v4580_v36 }
 0x4f9   : > { %3326 = vmatpush1.bf16.msra.mxu0 %v4572_v50  ;;  %3959 = vmatpush3.bf16.msra.mxu1 %v4581_v41  ;;  %v4590_v41 = vld [vmem:[#allocation7 + $0x188] ss:$12 sps:$4 sm:$0xff]  }
 0x4fa   : > { %3327 = vmatprep.subr.bf16.mxu0 %v4579_v38  ;;  %3960 = vmatprep.subr.bf16.mxu1 %v4585_v47  ;;  %v4601_v47 = vld [vmem:[#allocation7 + $0x1cc] ss:$12 sps:$4 sm:$0xff]  }
 0x4fd   : > { %3328 = vmatpush1.bf16.msra.mxu0 %v4577_v39  ;;  %3961 = vmatpush3.bf16.msra.mxu1 %v4586_v25  ;;  %v4587_v39 = vld [vmem:[#allocation7 + $0x180] ss:$12 sps:$4 sm:$0xff]   ;;  %v4599_v25 = vld [vmem:[#allocation7 + $0x1c8] ss:$12 sps:$4 sm:$0xff]  }
 0x4fe   : > { %3329 = vmatprep.subr.bf16.mxu0 %v4584_v45  ;;  %4069 = vmatprep.subr.bf16.mxu1 %v4835_v21  ;;  %v4595_v45 = vld [vmem:[#allocation7 + $0x1b0] ss:$12 sps:$4 sm:$0xff]  }
 0x501   : > { %3330 = vmatpush1.bf16.msra.mxu0 %v4582_v44  ;;  %v4591_v44 = vld [vmem:[#allocation7 + $0x198] ss:$12 sps:$4 sm:$0xff]  }
 0x502   : > { %3342 = vmatprep.subr.bf16.mxu0 %v4589_v49 }
 0x522   : > { %v2470_v62 = vpop.xlane.xlu1 %2469 }
 0x526   : > { %v2473_v37 = vpop.xlane.xlu1 %2472 }
 0x52f   : > { %v2228_v33 = vpop.xlane.xlu1 %2227 }
 0x530   : > { %4643 = vrcp.f32 %v2228_v33 }
 0x531   : > { %v2231_v6 = vpop.xlane.xlu0 %2230 }
 0x532   : > { %4645 = vrcp.f32 %v2231_v6 }
 0x533   : > { %4647 = vrcp.f32 %v2470_v62 }
 0x534   : > { %4649 = vrcp.f32 %v2473_v37 }
 0x53a   : > { %v4644_v27 = vpop.eup %4643 }
 0x53c   : > { %v4646_v29 = vpop.eup %4645 }
 0x53d   : > { %v4648_v53 = vpop.eup %4647 }
 0x53e   : > { %v4650_v54 = vpop.eup %4649 }
 0x566   : > { %v2712_v62 = vpop.xlane.xlu1 %2711 }
 0x567   : > { %4651 = vrcp.f32 %v2712_v62 }
 0x56c   : > { %v2715_v0 = vpop.xlane.xlu1 %2714 }
 0x56d   : > { %4653 = vrcp.f32 %v2715_v0 }
 0x570   : > { %v2348_v12 = vpop.xlane.xlu1 %2347 }
 0x571   : > { %v4652_v3 = vpop.eup %4651 }
 0x574   : > { %v2351_v13 = vpop.xlane.xlu1 %2350 }
 0x577   : > { %v4654_v33 = vpop.eup %4653 }
 0x578   : > { %v2274_v17 = vpop.f32.mrb[24].mxu1  ;;  %v2106_v14 = vpop.xlane.xlu1 %2105 }
 0x579   : > { %v4019_v28 = vpop.f32.mrb[25].mxu1  ;;  %v2283_v32 = vmul.f32 %v4644_v27, %v2274_v17  ;;  %4655 = vrcp.f32 %v2106_v14 }
 0x57a   : > { %v2277_v30 = vpop.f32.mrb[26].mxu1 }
 0x57b   : > { %v2284_v34 = vmul.f32 %v4646_v29, %v2277_v30  ;;  %v4020_v35 = vpop.f32.mrb[27].mxu1 }
 0x57c   : > { %v2109_v15 = vpop.xlane.xlu1 %2108 }
 0x57d   : > { %v4196_v40 = vpack.i.bf16 %v2284_v34, %v2283_v32  ;;  %4657 = vrcp.f32 %v2109_v15 }
 0x57e   : > { %4659 = vrcp.f32 %v2348_v12 }
 0x57f   : > { %4197 = vrot.lane.b32.xlu0 %v4196_v40, %s4837_s21  ;;  %4661 = vrcp.f32 %v2351_v13 }
 0x580   : > { %v5279_v63 = vpop.f32.mrb[28].mxu1 }
 0x581   : > { %v4031_v23 = vpop.f32.mrb[29].mxu1 }
 0x582   : > { %v5281_v42 = vpop.f32.mrb[30].mxu1  ;;  %v4593_v23 = vld [vmem:[#allocation7 + $0x19c] ss:$12 sps:$4 sm:$0xff]  }
 0x583   : > { %v4032_v46 = vpop.f32.mrb[31].mxu1  ;;  %v4656_v18 = vpop.eup %4655 }
 0x584   : > { %v2157_v24 = vmul.f32 %v4656_v18, %v5195_v5  ;;  %v4598_v46 = vld [vmem:[#allocation7 + $0x1b8] ss:$12 sps:$4 sm:$0xff]   ;;  %v2902_v18 = vsub.s32 0, %v5130_v19 }
 0x587   : > { %v4658_v22 = vpop.eup %4657 }
 0x588   : > { %v2516_v48 = vpop.f32.mrb[32].mxu1  ;;  %v2158_v26 = vmul.f32 %v4658_v22, %v5197_v7  ;;  %v4660_v50 = vpop.eup %4659  ;;  %v2906_v22 = vsub.s32 1, %v5130_v19 }
 0x589   : > { %v4043_v51 = vpop.f32.mrb[33].mxu1  ;;  %v2525_v8 = vmul.f32 %v4648_v53, %v2516_v48  ;;  %v4662_v31 = vpop.eup %4661  ;;  %v2399_v34 = vmul.f32 %v4660_v50, %v5279_v63  ;;  %v4594_v63 = vld [vmem:[#allocation7 + $0x1a0] ss:$12 sps:$4 sm:$0xff]   ;;  %v4602_v48 = vld [vmem:[#allocation7 + $0x1d0] ss:$12 sps:$4 sm:$0xff]  }
 0x58a   : > { %v2519_v52 = vpop.f32.mrb[34].mxu1  ;;  %v2400_v35 = vmul.f32 %v4662_v31, %v5281_v42  ;;  %v4597_v42 = vld [vmem:[#allocation7 + $0x1b4] ss:$12 sps:$4 sm:$0xff]   ;;  %v4605_v53 = vld [vmem:[#allocation7 + $0x1e4] ss:$12 sps:$4 sm:$0xff]  }
 0x58b   : > { %v2526_v43 = vmul.f32 %v4650_v54, %v2519_v52  ;;  %v4044_v55 = vpop.f32.mrb[35].mxu1  ;;  %v4606_v51 = vld [vmem:[#allocation7 + $0x1e8] ss:$12 sps:$4 sm:$0xff]   ;;  %v4607_v52 = vld [vmem:[#allocation7 + $0x1f8] ss:$12 sps:$4 sm:$0xff]  }
 0x58c   : > { %v4609_v54 = vld [vmem:[#allocation7 + $0x1fc] ss:$12 sps:$4 sm:$0xff]  }
 0x58d   : > { %v4201_v56 = vpack.i.bf16 %v2526_v43, %v2525_v8  ;;  %v4610_v8 = vld [vmem:[#allocation7 + $0x200] ss:$12 sps:$4 sm:$0xff]   ;;  %v4611_v55 = vld [vmem:[#allocation7 + $0x210] ss:$12 sps:$4 sm:$0xff]  }
 0x58e   : > { %v4613_v43 = vld [vmem:[#allocation7 + $0x214] ss:$12 sps:$4 sm:$0xff]  }
 0x58f   : > { %4202 = vrot.lane.b32.xlu1 %v4201_v56, %s4837_s21  ;;  %v4614_v56 = vld [vmem:[#allocation7 + $0x218] ss:$12 sps:$4 sm:$0xff]  }
 0x590   : > { %v5285_v57 = vpop.f32.mrb[36].mxu1 }
 0x591   : > { %v4055_v58 = vpop.f32.mrb[37].mxu1 }
 0x592   : > { %v5287_v59 = vpop.f32.mrb[38].mxu1  ;;  %v4617_v58 = vld [vmem:[#allocation7 + $0x22c] ss:$12 sps:$4 sm:$0xff]  }
 0x593   : > { %v4056_v60 = vpop.f32.mrb[39].mxu1 }
 0x594   : > { %v4615_v60 = vld [vmem:[#allocation7 + $0x228] ss:$12 sps:$4 sm:$0xff]  }
 0x59e   : > { %2592 = vadd.xlane.f32.xlu0 %v2591_v61  ;;  %v4618_v61 = vld [vmem:[#allocation7 + $0x230] ss:$12 sps:$4 sm:$0xff]  }
 0x5b3   : > { %2589 = vadd.xlane.f32.xlu1 %v2588_v1  ;;  %v2758_v37 = vpop.f32.mrb[40].mxu1 }
 0x5b4   : > { %v4067_v4 = vpop.f32.mrb[41].mxu1  ;;  %v2767_v9 = vmul.f32 %v4652_v3, %v2758_v37 }
 0x5b5   : > { %v2761_v6 = vpop.f32.mrb[42].mxu1 }
 0x5b6   : > { %v2768_v10 = vmul.f32 %v4654_v33, %v2761_v6  ;;  %v4068_v11 = vpop.f32.mrb[43].mxu1 }
 0x5b8   : > { %v4206_v20 = vpack.i.bf16 %v2768_v10, %v2767_v9 }
 0x5c4   : > { %4207 = vrot.lane.b32.xlu1 %v4206_v20, %s4837_s21 }
 0x5f1   : > { %v4198_v2 = vpop.permute.xlu0 %4197 }
 0x5f2   : > { %v4200_v17 = vunpack.i.h.bf16 %v4198_v2  ;;  %v4199_v27 = vunpack.i.l.bf16 %v4198_v2 }
 0x5f4   : > { %v2794_v28 = vsel %vm2041_vm1, %v2158_v26, %v4200_v17  ;;  %v2793_v29 = vsel %vm2041_vm1, %v2157_v24, %v4199_v27 }
 0x5f5   : > { %v2799_v30 = vpack.c.bf16 %v2794_v28, %v2793_v29 }
 0x601   : > { %v4203_v32 = vpop.permute.xlu1 %4202 }
 0x602   : > { %v4205_v38 = vunpack.i.h.bf16 %v4203_v32  ;;  %v4204_v5 = vunpack.i.l.bf16 %v4203_v32 }
 0x604   : > { %v2795_v7 = vsel %vm2041_vm1, %v2399_v34, %v4204_v5  ;;  %v2796_v36 = vsel %vm2041_vm1, %v2400_v35, %v4205_v38 }
 0x605   : > { %v2800_v40 = vpack.c.bf16 %v2796_v36, %v2795_v7 }
 0x607   : > { %3331 = vmatprep.mubr.bf16.mxu0 %v2800_v40  ;;  %3417 = vmatprep.mubr.bf16.mxu1 %v2800_v40 }
 0x608   : > { %3332 = vmatmul.mubr.bf16.vlgmr.msra.gmra.mrb[28].mxu0 %v2799_v30  ;;  %3418 = vmatmul.mubr.bf16.vlgmr.msra.gmra.mrb[44].mxu1 %v2799_v30 }
 0x609   : > { %3343 = vmatpush1.bf16.msra.mxu0 %v4587_v39  ;;  %4070 = vmatpush3.bf16.msra.mxu1 %v4590_v41 }
 0x60a   : > { %3344 = vmatprep.subr.bf16.mxu0 %v4593_v23  ;;  %4071 = vmatprep.subr.bf16.mxu1 %v4835_v21 }
 0x60b   : > { %3374 = vmatprep.mubr.bf16.mxu0 %v4834_v16  ;;  %4085 = vmatprep.mubr.msk.bf16.mxu1 %vm4836_vm0, %v4835_v21  ;;  %v4603_v16 = vld [vmem:[#allocation7 + $0x1e0] ss:$12 sps:$4 sm:$0xff]  }
 0x60d   : > { %3345 = vmatpush1.bf16.msra.mxu0 %v4591_v44  ;;  %4072 = vmatpush3.bf16.msra.mxu1 %v4594_v63 }
 0x60e   : > { %3346 = vmatprep.subr.bf16.mxu0 %v4597_v42  ;;  %4073 = vmatprep.subr.bf16.mxu1 %v4835_v21 }
 0x611   : > { %3347 = vmatpush1.bf16.msra.mxu0 %v4595_v45  ;;  %4074 = vmatpush3.bf16.msra.mxu1 %v4598_v46 }
 0x612   : > { %3348 = vmatprep.subr.bf16.mxu0 %v4601_v47  ;;  %4075 = vmatprep.subr.bf16.mxu1 %v4835_v21 }
 0x615   : > { %3349 = vmatpush1.bf16.msra.mxu0 %v4599_v25  ;;  %4076 = vmatpush3.bf16.msra.mxu1 %v4602_v48 }
 0x616   : > { %3350 = vmatprep.subr.bf16.mxu0 %v4605_v53  ;;  %4077 = vmatprep.subr.bf16.mxu1 %v4835_v21 }
 0x619   : > { %3351 = vmatpush1.bf16.msra.mxu0 %v4603_v16  ;;  %4078 = vmatpush3.bf16.msra.mxu1 %v4606_v51 }
 0x61a   : > { %3352 = vmatprep.subr.bf16.mxu0 %v4609_v54  ;;  %4079 = vmatprep.subr.bf16.mxu1 %v4835_v21 }
 0x61d   : > { %3353 = vmatpush1.bf16.msra.mxu0 %v4607_v52  ;;  %4080 = vmatpush3.bf16.msra.mxu1 %v4610_v8 }
 0x61e   : > { %3354 = vmatprep.subr.bf16.mxu0 %v4613_v43  ;;  %4081 = vmatprep.subr.bf16.mxu1 %v4835_v21 }
 0x621   : > { %3355 = vmatpush1.bf16.msra.mxu0 %v4611_v55  ;;  %4082 = vmatpush3.bf16.msra.mxu1 %v4614_v56 }
 0x622   : > { %3356 = vmatprep.subr.bf16.mxu0 %v4617_v58  ;;  %4083 = vmatprep.subr.bf16.mxu1 %v4835_v21 }
 0x625   : > { %3357 = vmatpush1.bf16.msra.mxu0 %v4615_v60  ;;  %4084 = vmatpush3.bf16.msra.mxu1 %v4618_v61 }
 0x62b   : > { %v2593_v62 = vpop.xlane.xlu0 %2592 }
 0x62c   : > { %4663 = vrcp.f32 %v2593_v62 }
 0x636   : > { %v4664_v1 = vpop.eup %4663 }
 0x637   : > { %v2642_v33 = vmul.f32 %v4664_v1, %v5287_v59  ;;  %v2898_v59 = vld [vmem:[%s5377_s3] sm:$0x7] }
 0x638   : > { %v2903_v24 = vrot.slane %v2898_v59, %v2902_v18  ;;  %v2907_v26 = vrot.slane %v2898_v59, %v2906_v22 }
 0x640   : > { %v2590_v0 = vpop.xlane.xlu1 %2589 }
 0x641   : > { %4665 = vrcp.f32 %v2590_v0 }
 0x644   : > { %v4208_v49 = vpop.permute.xlu1 %4207 }
 0x645   : > { %v4210_v37 = vunpack.i.h.bf16 %v4208_v49  ;;  %v4209_v6 = vunpack.i.l.bf16 %v4208_v49 }
 0x647   : > { %v2798_v9 = vsel %vm2041_vm1, %v2642_v33, %v4210_v37 }
 0x64b   : > { %v4666_v3 = vpop.eup %4665 }
 0x64c   : > { %v2641_v4 = vmul.f32 %v4666_v3, %v5285_v57  ;;  %v2910_v57 = vsub.s32 2, %v5130_v19 }
 0x64e   : > { %v2797_v10 = vsel %vm2041_vm1, %v2641_v4, %v4209_v6  ;;  %v2911_v2 = vrot.slane %v2898_v59, %v2910_v57 }
 0x64f   : > { %v2801_v21 = vpack.c.bf16 %v2798_v9, %v2797_v10 }
 0x651   : > { %3375 = vmatmul.mubr.bf16.vlgmr.msra.gmra.mrb[28].mxu0 %v2801_v21  ;;  %4086 = vmatmul.mubr.bf16.vlgmr.msra.gmra.mrb[48].mxu1 %v2801_v21 }
 0x6db   : > { %v3962_v11 = vpop.f32.mrb[44].mxu1 }
 0x6dc   : > { %v3963_v20 = vpop.f32.mrb[45].mxu1 }
 0x6dd   : > { %v3964_v12 = vadd.f32 %v3963_v20, %v3962_v11  ;;  %v3965_v13 = vpop.f32.mrb[46].mxu1 }
 0x6de   : > { %v3966_v14 = vpop.f32.mrb[47].mxu1 }
 0x6df   : > { %v3967_v15 = vadd.f32 %v3966_v14, %v3965_v13  ;;  %v3420_v17 = vadd.f32 %v3964_v12, %v2911_v2 }
 0x6e1   : > { %v3423_v32 = vadd.f32 %v3967_v15, %v2911_v2 }
 0x724   : > { %v3376_v27 = vpop.f32.mrb[28].mxu0  ;;  %v3460_v28 = vpop.f32.mrb[48].mxu1 }
 0x725   : > { %v4089_v29 = vadd.f32 %v3376_v27, %v2903_v24  ;;  %v3461_v30 = vadd.f32 %v3460_v28, %v3420_v17  ;;  %v3378_v50 = vpop.f32.mrb[29].mxu0  ;;  %v4087_v31 = vpop.f32.mrb[49].mxu1 }
 0x726   : > { %v4090_v34 = vadd.f32 %v3378_v50, %v2907_v26  ;;  %v3380_v19 = vpop.f32.mrb[30].mxu0  ;;  %v3463_v35 = vpop.f32.mrb[50].mxu1 }
 0x727   : > { %3467 = vst [vmem:[%s244_s5] sm:$0xff] %v4089_v29  ;;  %3469 = vst [vmem:[%s244_s5 + $0x10] sm:$0xff] %v3461_v30  ;;  %v4091_v38 = vadd.f32 %v3380_v19, %v2903_v24  ;;  %v3464_v5 = vadd.f32 %v3463_v35, %v3423_v32  ;;  %v3382_v7 = vpop.f32.mrb[31].mxu0  ;;  %v4088_v36 = vpop.f32.mrb[51].mxu1 }
 0x728   : > { %3468 = vst [vmem:[%s244_s5 + $0x8] sm:$0xff] %v4090_v34  ;;  %v4092_v40 = vadd.f32 %v3382_v7, %v2907_v26 }
 0x729   : > { %3470 = vst [vmem:[%s244_s5 + $0x18] sm:$0xff] %v4091_v38  ;;  %3472 = vst [vmem:[%s244_s5 + $0x28] sm:$0xff] %v3464_v5 }
 0x72a   : > { %3471 = vst [vmem:[%s244_s5 + $0x20] sm:$0xff] %v4092_v40 }
 0x72b   : > { %4766 = shalt.err (!%p4763_p2)
}
 0x72c   : > { %s4767_s10 = scalar_lea.hbm %s5330_s26, 768  ;;  %s4771_s21 = scalar_lea.hbm %s5378_s4, 1536 }
 0x72d   : > { %p4768_p13 = scmp.ne.s32.totalorder %s5330_s26, %s4767_s10  ;;  %p4772_p4 = scmp.lt.u32.totalorder %s5330_s26, %s5378_s4 }
 0x72e   : > { %p4773_p7 = scmp.lt.u32.totalorder %s4771_s21, %s4767_s10  ;;  %p4775_p11 = scmp.lt.u32.totalorder %s4767_s10, %s5330_s26 }
 0x72f   : > { %p4769_p6 = pnand %p4768_p13, %p5396_p0 }
 0x730   : > { %p4774_p8 = por %p4773_p7, %p4772_p4 }
 0x731   : > { %p4770_p10 = pneg %p4769_p6 }
 0x732   : > { %p4776_p1 = por %p4775_p11, %p4774_p8 }
 0x734   : > { %p4777_p3 = pnand %p4776_p1, %p4770_p10 }
 0x736   : > { %4780 = shalt.err (!%p4777_p3)
}
 0x737   : > { %s4839_s5 = smov 384   ;;  %s4840_s7 = smov 24  }
 0x738   : > { %4127 = dma.vmem_to_hbm [thread:$0]  (%p5396_p0), %s5325_s25, 768, %s5330_s26, %s3474_s24, %s4839_s5, %s4839_s5, %s4840_s7  }
 0x739 PF: > { %s3502_s19 = sand.u32 1, %s4811_s15   ;;  %p5397_p5 = scmp.ne.s32.totalorder %s5383_s22, 0 }
 0x73a   : > { %p5398_p9 = scmp.ge.s32.totalorder %s4823_s18, 2  ;;  %s3503_s28 = scalar_lea.sflag [#allocation4], %s3502_s19 }
 0x73c   : > { %p4141_p12 = pnand %p5398_p9, %p5397_p5 }
 0x73e   : > { %4806 = dma.done.wait (!%p4141_p12), %s3503_s28, 768  }
 0x73f   : > { %4808 = vsyncadd (!%p4141_p12), %s3503_s28, 4294966528  ;;  %p18_p2 = scmp.ge.s32.totalorder %s4976_s11, 4   ;;  %s5399_s15 = smov %s4815_s16 }
 0x740   : > { %s5400_s16 = smov %s4819_s17  ;;  %s5401_s17 = smov %s4985_s14 }
 0x741   : > { %s5402_s18 = smov %s4976_s11  ;;  %20 = sbr.rel (!%p18_p2) target bundleno = 6 (0x6), region = 89 }
 0x748   :  { %3508 = vsyncpa [#allocation3], 1 }
 0x749   :  { %3510 = vsyncpa [#allocation3 + $0x1], 1 }
 0x74a   :  { %3511 = vsyncpa [#allocation6], 1 }
 0x74b   :  { %3512 = vsyncpa [#allocation4], 1 }
 0x74c   :  { %3514 = vsyncpa [#allocation4 + $0x1], 1 }

</bundles_post_ra>
